<compile_context>
chip_gen: v7x
topology: tpu7x:2x2x1
jax: 0.10.0
libtpu: 0.0.40
codegen_flags: <defaults>
</compile_context>

<pallas_src>
import functools

import jax
import jax.numpy as jnp
from jax.experimental import pallas as pl
from jax.experimental.pallas import tpu as pltpu

EPS = 1e-5


def bilinear_x2_matrix(size_in: int) -> jnp.ndarray:
    """(2*size_in, size_in) interpolation matrix matching PyTorch
    Upsample(scale_factor=2, mode='bilinear', align_corners=False)."""
    size_out = 2 * size_in
    dst = jnp.arange(size_out, dtype=jnp.float32)
    src = jnp.maximum((dst + 0.5) / 2.0 - 0.5, 0.0)   # PyTorch clamps negative src to 0
    i0 = jnp.floor(src).astype(jnp.int32)
    frac = src - i0.astype(jnp.float32)
    i0 = jnp.clip(i0, 0, size_in - 1)
    i1 = jnp.clip(i0 + 1, 0, size_in - 1)
    rows = jnp.arange(size_out)
    w = jnp.zeros((size_out, size_in), jnp.float32)
    w = w.at[rows, i0].add(1.0 - frac)
    w = w.at[rows, i1].add(frac)
    return w


def kron_upsample_matrix(h: int, w: int) -> jnp.ndarray:
    """K (H*W, 2H*2W) with K[h*W+w, a*2W+b] = Wh[a,h] * Ww[b,w]."""
    wh = bilinear_x2_matrix(h)   # (2H, H)
    ww = bilinear_x2_matrix(w)   # (2W, W)
    return jnp.einsum('ah,bw->hwab', wh, ww).reshape(h * w, 4 * h * w)


def _upsample_bn_relu_kernel(gamma_ref, beta_ref, x_ref, k_ref, o_ref,
                             *, n_batch, block_c, hw4):
    """One grid step == block_c channels.

    x_ref: (block_c, N, H*W)    k_ref: (H*W, 4*H*W)    o_ref: (block_c, N, 4*H*W)
    gamma_ref / beta_ref: full (C,) in SMEM.
    """
    c_blk = pl.program_id(0)

    # Single fused MXU matmul for all channels/batches in this block.
    x2 = x_ref[...].reshape(block_c * n_batch, -1).astype(jnp.float32)
    up = jnp.dot(x2, k_ref[...], preferred_element_type=jnp.float32)   # (bc*N, 4HW)

    count = float(n_batch * hw4)
    for j in range(block_c):                       # small static unroll (block_c <= 4)
        slab = up[j * n_batch:(j + 1) * n_batch, :]                    # (N, 4HW)
        s = jnp.sum(slab)
        ss = jnp.sum(slab * slab)
        mean = s / count
        var = jnp.maximum(ss / count - mean * mean, 0.0)               # clamp >= 0
        inv = jax.lax.rsqrt(var + EPS)
        cidx = c_blk * block_c + j
        scale = gamma_ref[cidx] * inv
        shift = beta_ref[cidx] - mean * scale
        o_ref[j] = jnp.maximum(slab * scale + shift, 0.0).astype(o_ref.dtype)


def upsampling_block(x, gamma, beta, *, block_c=None):
    """x: (N, C, H, W) float32 -> (N, C, 2H, 2W) float32."""
    N, C, H, W = x.shape
    if block_c is None:
        # Biggest channel block that still leaves >=2 parallel grid steps (v7x 2 TCs).
        block_c = C // 2 if (C % 2 == 0 and C >= 2) else 1
    assert C % block_c == 0
    hw = H * W
    hw4 = 4 * H * W

    k_mat = kron_upsample_matrix(H, W)                       # (HW, 4HW)
    # Layout plumbing in the wrapper: channel-major so every block's minor-most two
    # dims are full-extent / 128-multiples, and the kernel's output lanes are 4HW-wide.
    x_r = x.reshape(N, C, hw).transpose(1, 0, 2)             # (C, N, HW)

    kernel = functools.partial(_upsample_bn_relu_kernel,
                               n_batch=N, block_c=block_c, hw4=hw4)
    out_r = pl.pallas_call(
        kernel,
        out_shape=jax.ShapeDtypeStruct((C, N, hw4), x.dtype),
        grid_spec=pltpu.PrefetchScalarGridSpec(
            num_scalar_prefetch=0,
            grid=(C // block_c,),
            in_specs=[
                pl.BlockSpec(memory_space=pltpu.MemorySpace.SMEM),       # gamma (C,)
                pl.BlockSpec(memory_space=pltpu.MemorySpace.SMEM),       # beta  (C,)
                pl.BlockSpec((block_c, N, hw), lambda c: (c, 0, 0)),     # x block
                pl.BlockSpec((hw, hw4), lambda c: (0, 0)),               # K (grid-invariant)
            ],
            out_specs=pl.BlockSpec((block_c, N, hw4), lambda c: (c, 0, 0)),
        ),
        compiler_params=pltpu.CompilerParams(
            dimension_semantics=("parallel",),
            vmem_limit_bytes=32 * 1024 * 1024,
        ),
    )(gamma, beta, x_r, k_mat)

    return out_r.reshape(C, N, 2 * H, 2 * W).transpose(1, 0, 2, 3)


def reference_forward(x, gamma, beta):
    """Pure-JAX reference (same math as PyTorch UpSamplingBlock in train mode)."""
    N, C, H, W = x.shape
    wh = bilinear_x2_matrix(H)
    wwt = bilinear_x2_matrix(W).T
    up = jnp.einsum('ah,nchw,wb->ncab', wh, x, wwt)
    mean = up.mean(axis=(0, 2, 3), keepdims=True)
    var = up.var(axis=(0, 2, 3), keepdims=True)      # biased, as in BN forward
    y = (up - mean) / jnp.sqrt(var + EPS) * gamma[None, :, None, None] + beta[None, :, None, None]
    return jnp.maximum(y, 0.0)


if __name__ == "__main__":
    key = jax.random.PRNGKey(0)
    N, C, H, W = 2, 4, 16, 16           # ch_in = 4 (ch_out is unused by the module)
    x = jax.random.normal(key, (N, C, H, W), dtype=jnp.float32)

    # Deterministic BatchNorm affine params (non-trivial to exercise scale/shift).
    gamma = 1.0 + 0.1 * jnp.arange(C, dtype=jnp.float32)
    beta = 0.05 * jnp.arange(C, dtype=jnp.float32)

    out = upsampling_block(x, gamma, beta)
    out = jax.block_until_ready(out)

    ref = reference_forward(x, gamma, beta)
    assert out.shape == (N, C, 2 * H, 2 * W)
    assert jnp.allclose(out, ref, atol=1e-4, rtol=1e-4), float(jnp.max(jnp.abs(out - ref)))

    print("KERNEL_OK")
</pallas_src>

<mosaic_0001>
module attributes {stable_mosaic.version = 11 : i64} {
  func.func @_upsample_bn_relu_kernel(%arg0: i32, %arg1: memref<4xf32, #tpu.memory_space<smem>>, %arg2: memref<4xf32, #tpu.memory_space<smem>>, %arg3: memref<2x2x256xf32, #tpu.memory_space<vmem>>, %arg4: memref<256x1024xf32, #tpu.memory_space<vmem>>, %arg5: memref<2x2x1024xf32, #tpu.memory_space<vmem>>) attributes {dimension_semantics = [#tpu.dimension_semantics<parallel>], iteration_bounds = array<i64: 2>, scalar_prefetch = 0 : i64, scratch_operands = 0 : i64, tpu.core_type = #tpu.core_type<tc>, window_params = [{transform_indices = @transform_0, window_bounds = array<i64: 4>}, {transform_indices = @transform_1, window_bounds = array<i64: 4>}, {transform_indices = @transform_2, window_bounds = array<i64: 2, 2, 256>}, {pipeline_mode = #tpu.pipeline_mode<synchronous>, transform_indices = @transform_3, window_bounds = array<i64: 256, 1024>}, {transform_indices = @transform_4, window_bounds = array<i64: 2, 2, 1024>}]} {
    %c0 = arith.constant 0 : index
    %c0_0 = arith.constant 0 : index
    %c0_1 = arith.constant 0 : index
    %0 = vector.load %arg3[%c0, %c0_0, %c0_1] : memref<2x2x256xf32, #tpu.memory_space<vmem>>, vector<2x2x256xf32>
    %1 = vector.shape_cast %0 : vector<2x2x256xf32> to vector<4x256xf32>
    %c0_2 = arith.constant 0 : index
    %c0_3 = arith.constant 0 : index
    %2 = vector.load %arg4[%c0_2, %c0_3] : memref<256x1024xf32, #tpu.memory_space<vmem>>, vector<256x1024xf32>
    %cst = arith.constant dense<0.000000e+00> : vector<4x1024xf32>
    %3 = tpu.matmul %1, %2, %cst {dimension_numbers = #tpu.dot_dimension_numbers<[1], [0], [0], [1], [0, 0, 1, 1], [], []>} : vector<4x256xf32>, vector<256x1024xf32>, vector<4x1024xf32> -> vector<4x1024xf32>
    %4 = vector.extract_strided_slice %3 {offsets = [0, 0], sizes = [2, 1024], strides = [1, 1]} : vector<4x1024xf32> to vector<2x1024xf32>
    %5 = vector.shape_cast %4 : vector<2x1024xf32> to vector<1x2x1024xf32>
    %cst_4 = arith.constant dense<0.000000e+00> : vector<1xf32>
    %6 = vector.multi_reduction <add>, %5, %cst_4 [1, 2] : vector<1x2x1024xf32> to vector<1xf32>
    %7 = vector.shape_cast %6 : vector<1xf32> to vector<1x1x1xf32>
    %8 = vector.extract %7[0, 0, 0] : f32 from vector<1x1x1xf32>
    %9 = arith.mulf %4, %4 : vector<2x1024xf32>
    %10 = vector.shape_cast %9 : vector<2x1024xf32> to vector<1x2x1024xf32>
    %cst_5 = arith.constant dense<0.000000e+00> : vector<1xf32>
    %11 = vector.multi_reduction <add>, %10, %cst_5 [1, 2] : vector<1x2x1024xf32> to vector<1xf32>
    %12 = vector.shape_cast %11 : vector<1xf32> to vector<1x1x1xf32>
    %13 = vector.extract %12[0, 0, 0] : f32 from vector<1x1x1xf32>
    %cst_6 = arith.constant 2.048000e+03 : f32
    %14 = arith.divf %8, %cst_6 : f32
    %cst_7 = arith.constant 2.048000e+03 : f32
    %15 = arith.divf %13, %cst_7 : f32
    %16 = arith.mulf %14, %14 : f32
    %17 = arith.subf %15, %16 : f32
    %cst_8 = arith.constant 0.000000e+00 : f32
    %18 = arith.maximumf %17, %cst_8 : f32
    %cst_9 = arith.constant 9.99999974E-6 : f32
    %19 = arith.addf %18, %cst_9 : f32
    %20 = math.rsqrt %19 : f32
    %c2_i32 = arith.constant 2 : i32
    %21 = arith.muli %arg0, %c2_i32 : i32
    %c0_i32 = arith.constant 0 : i32
    %22 = arith.addi %21, %c0_i32 : i32
    %23 = arith.index_cast %22 : i32 to index
    %24 = memref.load %arg1[%23] : memref<4xf32, #tpu.memory_space<smem>>
    %25 = arith.mulf %24, %20 : f32
    %26 = arith.index_cast %22 : i32 to index
    %27 = memref.load %arg2[%26] : memref<4xf32, #tpu.memory_space<smem>>
    %28 = arith.mulf %14, %25 : f32
    %29 = arith.subf %27, %28 : f32
    %30 = vector.broadcast %25 : f32 to vector<2x1024xf32>
    %31 = arith.mulf %4, %30 : vector<2x1024xf32>
    %32 = vector.broadcast %29 : f32 to vector<2x1024xf32>
    %33 = arith.addf %31, %32 : vector<2x1024xf32>
    %cst_10 = arith.constant 0.000000e+00 : f32
    %34 = vector.broadcast %cst_10 : f32 to vector<2x1024xf32>
    %35 = arith.maximumf %33, %34 : vector<2x1024xf32>
    %c0_11 = arith.constant 0 : index
    %c0_12 = arith.constant 0 : index
    %c0_13 = arith.constant 0 : index
    %36 = vector.load %arg5[%c0_11, %c0_12, %c0_13] : memref<2x2x1024xf32, #tpu.memory_space<vmem>>, vector<1x2x1024xf32>
    %37 = vector.shape_cast %36 : vector<1x2x1024xf32> to vector<2x1024xf32>
    %38 = vector.shape_cast %35 : vector<2x1024xf32> to vector<1x2x1024xf32>
    tpu.vector_store %arg5[%c0_11, %c0_12, %c0_13], %38 {strides = array<i32>} : memref<2x2x1024xf32, #tpu.memory_space<vmem>>, vector<1x2x1024xf32>,
    %39 = vector.extract_strided_slice %3 {offsets = [2, 0], sizes = [2, 1024], strides = [1, 1]} : vector<4x1024xf32> to vector<2x1024xf32>
    %40 = vector.shape_cast %39 : vector<2x1024xf32> to vector<1x2x1024xf32>
    %cst_14 = arith.constant dense<0.000000e+00> : vector<1xf32>
    %41 = vector.multi_reduction <add>, %40, %cst_14 [1, 2] : vector<1x2x1024xf32> to vector<1xf32>
    %42 = vector.shape_cast %41 : vector<1xf32> to vector<1x1x1xf32>
    %43 = vector.extract %42[0, 0, 0] : f32 from vector<1x1x1xf32>
    %44 = arith.mulf %39, %39 : vector<2x1024xf32>
    %45 = vector.shape_cast %44 : vector<2x1024xf32> to vector<1x2x1024xf32>
    %cst_15 = arith.constant dense<0.000000e+00> : vector<1xf32>
    %46 = vector.multi_reduction <add>, %45, %cst_15 [1, 2] : vector<1x2x1024xf32> to vector<1xf32>
    %47 = vector.shape_cast %46 : vector<1xf32> to vector<1x1x1xf32>
    %48 = vector.extract %47[0, 0, 0] : f32 from vector<1x1x1xf32>
    %cst_16 = arith.constant 2.048000e+03 : f32
    %49 = arith.divf %43, %cst_16 : f32
    %cst_17 = arith.constant 2.048000e+03 : f32
    %50 = arith.divf %48, %cst_17 : f32
    %51 = arith.mulf %49, %49 : f32
    %52 = arith.subf %50, %51 : f32
    %cst_18 = arith.constant 0.000000e+00 : f32
    %53 = arith.maximumf %52, %cst_18 : f32
    %cst_19 = arith.constant 9.99999974E-6 : f32
    %54 = arith.addf %53, %cst_19 : f32
    %55 = math.rsqrt %54 : f32
    %c2_i32_20 = arith.constant 2 : i32
    %56 = arith.muli %arg0, %c2_i32_20 : i32
    %c1_i32 = arith.constant 1 : i32
    %57 = arith.addi %56, %c1_i32 : i32
    %58 = arith.index_cast %57 : i32 to index
    %59 = memref.load %arg1[%58] : memref<4xf32, #tpu.memory_space<smem>>
    %60 = arith.mulf %59, %55 : f32
    %61 = arith.index_cast %57 : i32 to index
    %62 = memref.load %arg2[%61] : memref<4xf32, #tpu.memory_space<smem>>
    %63 = arith.mulf %49, %60 : f32
    %64 = arith.subf %62, %63 : f32
    %65 = vector.broadcast %60 : f32 to vector<2x1024xf32>
    %66 = arith.mulf %39, %65 : vector<2x1024xf32>
    %67 = vector.broadcast %64 : f32 to vector<2x1024xf32>
    %68 = arith.addf %66, %67 : vector<2x1024xf32>
    %cst_21 = arith.constant 0.000000e+00 : f32
    %69 = vector.broadcast %cst_21 : f32 to vector<2x1024xf32>
    %70 = arith.maximumf %68, %69 : vector<2x1024xf32>
    %c1 = arith.constant 1 : index
    %c0_22 = arith.constant 0 : index
    %c0_23 = arith.constant 0 : index
    %71 = vector.load %arg5[%c1, %c0_22, %c0_23] : memref<2x2x1024xf32, #tpu.memory_space<vmem>>, vector<1x2x1024xf32>
    %72 = vector.shape_cast %71 : vector<1x2x1024xf32> to vector<2x1024xf32>
    %73 = vector.shape_cast %70 : vector<2x1024xf32> to vector<1x2x1024xf32>
    tpu.vector_store %arg5[%c1, %c0_22, %c0_23], %73 {strides = array<i32>} : memref<2x2x1024xf32, #tpu.memory_space<vmem>>, vector<1x2x1024xf32>,
    return
  }
  func.func @transform_0(%arg0: i32) -> i32 {
    %c0_i32 = arith.constant 0 : i32
    %c0_i32_0 = arith.constant 0 : i32
    return %c0_i32 : i32
  }
  func.func @transform_1(%arg0: i32) -> i32 {
    %c0_i32 = arith.constant 0 : i32
    %c0_i32_0 = arith.constant 0 : i32
    return %c0_i32 : i32
  }
  func.func @transform_2(%arg0: i32) -> (i32, i32, i32) {
    %c0_i32 = arith.constant 0 : i32
    %c0_i32_0 = arith.constant 0 : i32
    %c0_i32_1 = arith.constant 0 : i32
    return %arg0, %c0_i32, %c0_i32_0 : i32, i32, i32
  }
  func.func @transform_3(%arg0: i32) -> (i32, i32) {
    %c0_i32 = arith.constant 0 : i32
    %c0_i32_0 = arith.constant 0 : i32
    %c0_i32_1 = arith.constant 0 : i32
    return %c0_i32, %c0_i32_0 : i32, i32
  }
  func.func @transform_4(%arg0: i32) -> (i32, i32, i32) {
    %c0_i32 = arith.constant 0 : i32
    %c0_i32_0 = arith.constant 0 : i32
    %c0_i32_1 = arith.constant 0 : i32
    return %arg0, %c0_i32, %c0_i32_0 : i32, i32, i32
  }
}

</mosaic_0001>

<bundles_post_ra>
// kernel: tpu_custom_call.1
= control target key start
LH: loop header
LB: loop body
LE: loop exit
PB: predicated region body
PF: predicated region fallthrough
CT: control target
= control target key end

     0   :  { %9 = vsyncpa [#allocation5], 0  ;;  %s2254_s0 = inlined_call_operand.hbm [shape: f32[4], index: 0, kind: input, shape index: {}]   ;;  %s2255_s1 = inlined_call_operand.vmem [shape: f32[4], index: 1, kind: input, shape index: {}]   ;;  %s2256_s2 = inlined_call_operand.hbm [shape: f32[4,2,256], index: 2, kind: input, shape index: {}]   ;;  %s2257_s3 = inlined_call_operand.hbm [shape: f32[256,1024], index: 3, kind: input, shape index: {}]   ;;  %s2258_s4 = inlined_call_operand.hbm [shape: f32[4,2,1024], index: 4, kind: output, shape index: {}]  }
   0x1   :  { %10 = vsyncpa [#allocation6], 0 }
   0x2   :  { %11 = vsyncpa [#allocation3], 0 }
   0x3   :  { %13 = vsyncpa [#allocation3 + $0x1], 0 }
   0x4   :  { %14 = vsyncpa [#allocation10], 0 }
   0x5   :  { %15 = vsyncpa [#allocation4], 0 }
   0x6   :  { %17 = vsyncpa [#allocation4 + $0x1], 0  ;;  %s1862_s15 = smov 0   ;;  %s1864_s16 = smov 0  }
   0x7   :  { %s1866_s17 = smov 0   ;;  %s1868_s18 = smov 0  }
   0x8 LB: > { %s1883_s19 = sadd.s32 4294967295, %s1823_s18   ;;  %s1272_s20 = sadd.s32 4294967294, %s1823_s18   ;;  %s1823_s18 = sphi %s1868_s18, %s2282_s18   ;;  %s1819_s17 = sphi %s1866_s17, %s2281_s17   ;;  %s1815_s16 = sphi %s1864_s16, %s2280_s16   ;;  %s1811_s15 = sphi %s1862_s15, %s2279_s15  }
   0x9   : > { %p85_p0 = scmp.ne.s32.totalorder %s1815_s16, %s1811_s15  ;;  %p2259_p1 = scmp.eq.s32.totalorder %s1883_s19, 0 }
   0xa   : > { %p136_p3 = scmp.eq.s32.totalorder %s1272_s20, 1  ;;  %p1273_p5 = scmp.ge.s32.totalorder %s1823_s18, 1 }
   0xb   : > { %p1892_p4 = por %p2259_p1, %p85_p0  ;;  %p143_p7 = scmp.lt.s32.totalorder %s1823_s18, 3 }
   0xc   : > { %p1897_p6 = por %p136_p3, %p85_p0  ;;  %s165_s26 = sshll.u32 %s2255_s1, 4  ;;  %s166_s26 = int_to_ptr.vmem [resolvable:$true] %s165_s26 }
   0xd   : > { %s2262_s21 = scalar_select %p1892_p4, 1, 0 }
   0xe   : > { %s2263_s22 = scalar_select %p1897_p6, 1, 0 }
   0xf   : > { %p1902_p8 = pnand %p1273_p5, %p143_p7  ;;  %s1825_s28 = smov [#allocation9]  }
  0x10   : > { %s175_s29 = sshll.u32 %s1825_s28, 4  ;;  %s1659_s6 = scalar_lea.hbm %s2254_s0, 16  ;;  %s1918_s29 = int_to_ptr.vmem [resolvable:$true] %s175_s29 }
  0x11   : > { %p1585_p10 = pneg %p1902_p8  ;;  %p1660_p12 = scmp.ne.s32.totalorder %s2254_s0, %s1659_s6 }
  0x12   : > { %p1666_p5 = scmp.lt.u32.totalorder %s1659_s6, %s2254_s0 }
  0x13   : > { %p1914_p11 = pnand %p1585_p10, %p2259_p1 }
  0x15   : > { %p1661_p13 = pneg %p1914_p11 }
  0x17   : > { %p1662_p0 = pnand %p1661_p13, %p1660_p12 }
  0x19   : > { %p1663_p3 = pneg %p1662_p0 }
  0x1b   : > { %p1668_p7 = pnand %p1666_p5, %p1663_p3 }
  0x1d   : > { %1671 = shalt.err (!%p1668_p7)
}
  0x1e   : > { %s1826_s11 = smov [#allocation2]   ;;  %s1672_s14 = scalar_lea.vmem %s166_s26, 16 }
  0x1f   : > { %1588 = dma.hbm_to_smem (!%p1914_p11), %s2254_s0, 16, %s1826_s11, [#allocation5]  }
  0x20   : > { %p1673_p10 = scmp.ne.s32.totalorder %s166_s26, %s1672_s14  ;;  %p1680_p9 = scmp.lt.s32.totalorder %s166_s26, %s166_s26 }
  0x21   : > { %p1681_p1 = scmp.lt.s32.totalorder %s1672_s14, %s1672_s14 }
  0x22   : > { %p1675_p12 = pnand %p1673_p10, %p1661_p13 }
  0x23   : > { %p1682_p2 = por %p1681_p1, %p1680_p9 }
  0x24   : > { %p1676_p0 = pneg %p1675_p12 }
  0x26   : > { %p1683_p6 = pnand %p1682_p2, %p1676_p0 }
  0x28   : > { %1686 = shalt.err (!%p1683_p6)
}
  0x29   : > { %s1827_s20 = smov [#allocation7]   ;;  %s1687_s28 = scalar_lea.hbm %s2257_s3, 32768 }
  0x2a   : > { %1591 = dma.vmem_to_smem (!%p1914_p11), %s166_s26, 16, %s1827_s20, [#allocation6]  }
  0x2b   : > { %p1688_p3 = scmp.ne.s32.totalorder %s2257_s3, %s1687_s28  ;;  %p1694_p1 = scmp.lt.u32.totalorder %s1687_s28, %s2257_s3 }
  0x2d   : > { %p1690_p5 = pnand %p1688_p3, %p1661_p13 }
  0x2f   : > { %p1691_p7 = pneg %p1690_p5 }
  0x31   : > { %p1696_p2 = pnand %p1694_p1, %p1691_p7 }
  0x33   : > { %1699 = shalt.err (!%p1696_p2)
}
  0x34   : > { %s1700_s26 = scalar_lea.vmem %s1918_s29, 32768  ;;  %p1708_p12 = scmp.lt.s32.totalorder %s1918_s29, %s1918_s29 }
  0x35   : > { %p1701_p6 = scmp.ne.s32.totalorder %s1918_s29, %s1700_s26  ;;  %p1709_p0 = scmp.lt.s32.totalorder %s1700_s26, %s1700_s26 }
  0x37   : > { %p1703_p9 = pnand %p1701_p6, %p1661_p13  ;;  %p1710_p3 = por %p1709_p0, %p1708_p12 }
  0x39   : > { %p1704_p10 = pneg %p1703_p9 }
  0x3b   : > { %p1711_p5 = pnand %p1710_p3, %p1704_p10 }
  0x3d   : > { %1714 = shalt.err (!%p1711_p5)
}
  0x3e   : > { %s1828_s8 = smov 1024   ;;  %s1829_s9 = smov 64  }
  0x3f   : > { %1594 = dma.hbm_to_vmem [thread:$0]  (!%p1914_p11), %s2257_s3, 32768, %s1918_s29, [#allocation10], %s1828_s8, %s1828_s8, %s1829_s9  }
  0x40   : > { %s1971_s12 = sadd.s32 1, %s1823_s18   ;;  %s72_s14 = sadd.s32 1, %s1819_s17 }
  0x41   : > { %s69_s13 = ssub.s32 %s1823_s18, %s1971_s12  ;;  %p79_p7 = scmp.ne.s32.totalorder %s1819_s17, %s1815_s16 }
  0x42   : > { %p70_p13 = scmp.eq.s32.totalorder %s69_s13, 0  ;;  %p80_p1 = scmp.eq.s32.totalorder %s1823_s18, 0 }
  0x43   : > { %p1606_p2 = scmp.lt.s32.totalorder %s1823_s18, 2  ;;  %p2266_p9 = scmp.eq.s32.totalorder %s1883_s19, 1 }
  0x44   : > { %s1981_s20 = scalar_select %p70_p13, %s1819_s17, %s72_s14  }
  0x45   : > { %p81_p6 = por %p80_p1, %p79_p7  ;;  %p1985_p10 = por %p2266_p9, %p79_p7 }
  0x46   : > { %s189_s24 = sand.u32 1, %s1819_s17   ;;  %s1298_s25 = sshll.u32 %s1823_s18, 7 }
  0x47   : > { %s2267_s27 = scalar_select %p1985_p10, 1, 0 }
  0x48   : > { %s1278_s29 = sshll.u32 %s189_s24, 3  ;;  %s1994_s5 = scalar_lea.hbm %s2256_s2, %s1298_s25 }
  0x49   : > { %s193_s6 = scalar_lea.vmem [#allocation8], %s1278_s29  ;;  %p1996_p11 = pnand %p1606_p2, %p81_p6 }
  0x4a   : > { %s201_s7 = sshll.u32 %s193_s6, 4  ;;  %s2002_s8 = scalar_lea.sflag [#allocation3], %s189_s24  ;;  %s2000_s7 = int_to_ptr.vmem [resolvable:$true] %s201_s7 }
  0x4b   : > { %s1715_s10 = scalar_lea.hbm %s1994_s5, 128  ;;  %p1717_p0 = pneg %p1996_p11 }
  0x4c   : > { %p1716_p12 = scmp.ne.s32.totalorder %s1994_s5, %s1715_s10  ;;  %s1720_s14 = scalar_lea.hbm %s2256_s2, 256 }
  0x4d   : > { %p1721_p13 = scmp.lt.u32.totalorder %s1994_s5, %s2256_s2  ;;  %p1722_p7 = scmp.lt.u32.totalorder %s1720_s14, %s1715_s10 }
  0x4e   : > { %p1718_p3 = pnand %p1717_p0, %p1716_p12  ;;  %p1724_p2 = scmp.lt.u32.totalorder %s1715_s10, %s1994_s5 }
  0x4f   : > { %p1723_p1 = por %p1722_p7, %p1721_p13 }
  0x50   : > { %p1719_p5 = pneg %p1718_p3 }
  0x51   : > { %p1725_p6 = por %p1724_p2, %p1723_p1 }
  0x53   : > { %p1726_p9 = pnand %p1725_p6, %p1719_p5 }
  0x55   : > { %1729 = shalt.err (!%p1726_p9)
}
  0x56   : > { %s1730_s24 = scalar_lea.vmem %s2000_s7, 128  ;;  %s1830_s28 = smov [#allocation8]  }
  0x57   : > { %p1731_p12 = scmp.ne.s32.totalorder %s2000_s7, %s1730_s24  ;;  %s1735_s30 = sshll.u32 %s1830_s28, 4  ;;  %s1736_s30 = int_to_ptr.vmem [resolvable:$false] %s1735_s30 }
  0x58   : > { %s1737_s6 = scalar_lea.vmem %s1736_s30, 256  ;;  %p1738_p4 = scmp.lt.s32.totalorder %s2000_s7, %s1736_s30 }
  0x59   : > { %p1733_p3 = pnand %p1731_p12, %p1717_p0  ;;  %p1739_p13 = scmp.lt.s32.totalorder %s1737_s6, %s1730_s24 }
  0x5b   : > { %p1734_p10 = pneg %p1733_p3  ;;  %p1740_p7 = por %p1739_p13, %p1738_p4 }
  0x5d   : > { %p1741_p1 = pnand %p1740_p7, %p1734_p10 }
  0x5f   : > { %1744 = shalt.err (!%p1741_p1)
}
  0x60   : > { %s1831_s10 = smov 4   ;;  %213 = sbr.rel (%p1902_p8) target bundleno = 853 (0x355), region = 36 }
  0x61   : > { %1598 = dma.hbm_to_vmem [thread:$0]  (!%p1996_p11), %s1994_s5, 128, %s2000_s7, %s2002_s8, %s1829_s9, %s1829_s9, %s1831_s10  }
  0x62   : > { %p2269_p0 = scmp.eq.s32.totalorder (!%p1902_p8), %s1883_s19, 0 }
  0x67   : > { %1790 = dma.done.wait (%p2269_p0), [#allocation5], 16   ;;  %p2270_p5 = pmov %p2269_p0 }
  0x68   : > { %p2271_p4 = pmov %p2269_p0 }
  0x69   : > { %1792 = vsyncadd (%p2270_p5), [#allocation5], 4294967280 }
  0x6a   : > { %1794 = dma.done.wait (%p2271_p4), [#allocation6], 16   ;;  %p2272_p10 = pmov %p2269_p0 }
  0x6b   : > { %s2043_s26 = sand.u32 1, %s1815_s16   ;;  %p2273_p8 = scmp.ne.s32.totalorder %s2262_s21, 0 }
  0x6c   : > { %1796 = vsyncadd (%p2272_p10), [#allocation6], 4294967280  ;;  %s1285_s23 = sshll.u32 %s2043_s26, 3  ;;  %s224_s9 = scalar_lea.sflag [#allocation3], %s2043_s26 }
  0x6d   : > { %s2047_s5 = scalar_lea.vmem [#allocation8], %s1285_s23 }
  0x6e   : > { %1798 = dma.done.wait (%p2273_p8), %s224_s9, 128  }
  0x6f   : > { %1800 = vsyncadd (%p2273_p8), %s224_s9, 4294967168  ;;  %p2274_p11 = pmov %p2269_p0 }
  0x70   : > { %p2275_p2 = pmov %p2269_p0 }
  0x71   : > { %1802 = dma.done.wait (%p2274_p11), [#allocation10], 32768  }
  0x72   : > { %1804 = vsyncadd (%p2275_p2), [#allocation10], 4294934528 }
  0x73   : > { %236 = sfence }
  0x74   : > { %v262_v0 = vld [vmem:[#allocation9 + $0x8] sm:$0xff]  ;;  %v261_v2 = vld [vmem:[#allocation9] sm:$0xff]  ;;  %v264_v5 = vld [vmem:[#allocation9 + $0x18] sm:$0xff]  ;;  %vm814_vm0 = vcmask 1041408   ;;  %s1833_s25 = smov 0.0   ;;  %s2160_s28 = sshll.u32 %s1883_s19, 1 }
  0x75   : > { %v270_v1 = vld [vmem:[#allocation9 + $0x48] sm:$0xff]  ;;  %v269_v4 = vld [vmem:[#allocation9 + $0x40] sm:$0xff]  ;;  %v272_v6 = vld [vmem:[#allocation9 + $0x58] sm:$0xff]  ;;  %s885_s30 = sld [smem:[#allocation2 + %s2160_s28]]  ;;  %p2276_p9 = scmp.ne.s32.totalorder %s2267_s27, 0 }
  0x76   : > { %v1301_v3 = vpack.c.bf16 %v270_v1, %v262_v0  ;;  %v1303_v7 = vpack.c.bf16 %v269_v4, %v261_v2  ;;  %v1365_v8 = vpack.c.bf16 %v272_v6, %v264_v5  ;;  %v278_v9 = vld [vmem:[#allocation9 + $0x88] sm:$0xff]  ;;  %v263_v11 = vld [vmem:[#allocation9 + $0x10] sm:$0xff]  ;;  %v277_v14 = vld [vmem:[#allocation9 + $0x80] sm:$0xff]  ;;  %s887_s6 = sld [smem:[#allocation7 + %s2160_s28]] }
  0x77   : > { %v286_v10 = vld [vmem:[#allocation9 + $0xc8] sm:$0xff]  ;;  %v271_v13 = vld [vmem:[#allocation9 + $0x50] sm:$0xff]  ;;  %v285_v15 = vld [vmem:[#allocation9 + $0xc0] sm:$0xff] }
  0x78   : > { %1302 = vmatprep.subr.bf16.mxu0 %v1301_v3  ;;  %v1305_v12 = vpack.c.bf16 %v286_v10, %v278_v9  ;;  %1366 = vmatprep.subr.bf16.mxu1 %v1365_v8  ;;  %v1367_v16 = vpack.c.bf16 %v271_v13, %v263_v11  ;;  %v1307_v17 = vpack.c.bf16 %v285_v15, %v277_v14  ;;  %v280_v18 = vld [vmem:[#allocation9 + $0x98] sm:$0xff]  ;;  %v294_v20 = vld [vmem:[#allocation9 + $0x108] sm:$0xff]  ;;  %v279_v23 = vld [vmem:[#allocation9 + $0x90] sm:$0xff] }
  0x79   : > { %1304 = vmatpush1.bf16.msra.mxu0 %v1303_v7  ;;  %v288_v19 = vld [vmem:[#allocation9 + $0xd8] sm:$0xff]  ;;  %v302_v22 = vld [vmem:[#allocation9 + $0x148] sm:$0xff]  ;;  %v287_v24 = vld [vmem:[#allocation9 + $0xd0] sm:$0xff] }
  0x7a   : > { %1306 = vmatprep.subr.bf16.mxu0 %v1305_v12  ;;  %v1369_v21 = vpack.c.bf16 %v288_v19, %v280_v18  ;;  %1368 = vmatpush1.bf16.msra.mxu1 %v1367_v16  ;;  %v1309_v25 = vpack.c.bf16 %v302_v22, %v294_v20  ;;  %v1371_v26 = vpack.c.bf16 %v287_v24, %v279_v23  ;;  %v293_v27 = vld [vmem:[#allocation9 + $0x100] sm:$0xff]  ;;  %v296_v29 = vld [vmem:[#allocation9 + $0x118] sm:$0xff]  ;;  %v310_v31 = vld [vmem:[#allocation9 + $0x188] sm:$0xff] }
  0x7b   : > { %v301_v28 = vld [vmem:[#allocation9 + $0x140] sm:$0xff]  ;;  %v304_v30 = vld [vmem:[#allocation9 + $0x158] sm:$0xff]  ;;  %v318_v32 = vld [vmem:[#allocation9 + $0x1c8] sm:$0xff] }
  0x7c   : > { %1370 = vmatprep.subr.bf16.mxu1 %v1369_v21  ;;  %v1311_v33 = vpack.c.bf16 %v301_v28, %v293_v27  ;;  %v1373_v34 = vpack.c.bf16 %v304_v30, %v296_v29  ;;  %v295_v35 = vld [vmem:[#allocation9 + $0x110] sm:$0xff]  ;;  %v309_v37 = vld [vmem:[#allocation9 + $0x180] sm:$0xff]  ;;  %v1313_v38 = vpack.c.bf16 %v318_v32, %v310_v31  ;;  %v312_v40 = vld [vmem:[#allocation9 + $0x198] sm:$0xff] }
  0x7d   : > { %1308 = vmatpush1.bf16.msra.mxu0 %v1307_v17  ;;  %v303_v36 = vld [vmem:[#allocation9 + $0x150] sm:$0xff]  ;;  %v317_v39 = vld [vmem:[#allocation9 + $0x1c0] sm:$0xff]  ;;  %v320_v41 = vld [vmem:[#allocation9 + $0x1d8] sm:$0xff] }
  0x7e   : > { %1310 = vmatprep.subr.bf16.mxu0 %v1309_v25  ;;  %1372 = vmatpush1.bf16.msra.mxu1 %v1371_v26  ;;  %v1375_v42 = vpack.c.bf16 %v303_v36, %v295_v35  ;;  %v326_v43 = vld [vmem:[#allocation9 + $0x208] sm:$0xff]  ;;  %v1377_v45 = vpack.c.bf16 %v320_v41, %v312_v40  ;;  %v311_v46 = vld [vmem:[#allocation9 + $0x190] sm:$0xff]  ;;  %v1315_v48 = vpack.c.bf16 %v317_v39, %v309_v37  ;;  %v328_v49 = vld [vmem:[#allocation9 + $0x218] sm:$0xff] }
  0x7f   : > { %v334_v44 = vld [vmem:[#allocation9 + $0x248] sm:$0xff]  ;;  %1374 = vmatprep.subr.bf16.mxu1 %v1373_v34  ;;  %v319_v47 = vld [vmem:[#allocation9 + $0x1d0] sm:$0xff]  ;;  %v336_v50 = vld [vmem:[#allocation9 + $0x258] sm:$0xff] }
  0x80   : > { %v1317_v51 = vpack.c.bf16 %v334_v44, %v326_v43  ;;  %v325_v52 = vld [vmem:[#allocation9 + $0x200] sm:$0xff]  ;;  %v1379_v54 = vpack.c.bf16 %v319_v47, %v311_v46  ;;  %v342_v55 = vld [vmem:[#allocation9 + $0x288] sm:$0xff]  ;;  %v1381_v57 = vpack.c.bf16 %v336_v50, %v328_v49  ;;  %v327_v58 = vld [vmem:[#allocation9 + $0x210] sm:$0xff]  ;;  %v1832_v47 = vmov 1983009808  }
  0x81   : > { %1312 = vmatpush1.bf16.msra.mxu0 %v1311_v33  ;;  %v333_v53 = vld [vmem:[#allocation9 + $0x240] sm:$0xff]  ;;  %v350_v56 = vld [vmem:[#allocation9 + $0x2c8] sm:$0xff]  ;;  %v335_v59 = vld [vmem:[#allocation9 + $0x250] sm:$0xff]  ;;  %v523_v49 = vlaneseq }
  0x82   : > { %1314 = vmatprep.subr.bf16.mxu0 %v1313_v38  ;;  %1376 = vmatpush1.bf16.msra.mxu1 %v1375_v42  ;;  %v1319_v60 = vpack.c.bf16 %v333_v53, %v325_v52  ;;  %v344_v61 = vld [vmem:[#allocation9 + $0x298] sm:$0xff]  ;;  %v1321_v63 = vpack.c.bf16 %v350_v56, %v342_v55  ;;  %v341_v0 = vld [vmem:[#allocation9 + $0x280] sm:$0xff]  ;;  %v1383_v2 = vpack.c.bf16 %v335_v59, %v327_v58  ;;  %v358_v3 = vld [vmem:[#allocation9 + $0x308] sm:$0xff] }
  0x83   : > { %1378 = vmatprep.subr.bf16.mxu1 %v1377_v45  ;;  %v352_v62 = vld [vmem:[#allocation9 + $0x2d8] sm:$0xff]  ;;  %v349_v1 = vld [vmem:[#allocation9 + $0x2c0] sm:$0xff]  ;;  %v366_v4 = vld [vmem:[#allocation9 + $0x348] sm:$0xff] }
  0x84   : > { %v1385_v5 = vpack.c.bf16 %v352_v62, %v344_v61  ;;  %v343_v6 = vld [vmem:[#allocation9 + $0x290] sm:$0xff]  ;;  %v1323_v8 = vpack.c.bf16 %v349_v1, %v341_v0  ;;  %v360_v9 = vld [vmem:[#allocation9 + $0x318] sm:$0xff]  ;;  %v1325_v11 = vpack.c.bf16 %v366_v4, %v358_v3  ;;  %v357_v12 = vld [vmem:[#allocation9 + $0x300] sm:$0xff] }
  0x85   : > { %1316 = vmatpush1.bf16.msra.mxu0 %v1315_v48  ;;  %v351_v7 = vld [vmem:[#allocation9 + $0x2d0] sm:$0xff]  ;;  %v368_v10 = vld [vmem:[#allocation9 + $0x358] sm:$0xff]  ;;  %v365_v13 = vld [vmem:[#allocation9 + $0x340] sm:$0xff]  ;;  %v521_v48 = vunpack.c.l.s4 %v1832_v47 }
  0x86   : > { %1318 = vmatprep.subr.bf16.mxu0 %v1317_v51  ;;  %1380 = vmatpush1.bf16.msra.mxu1 %v1379_v54  ;;  %v1387_v14 = vpack.c.bf16 %v351_v7, %v343_v6  ;;  %v374_v15 = vld [vmem:[#allocation9 + $0x388] sm:$0xff]  ;;  %v1389_v17 = vpack.c.bf16 %v368_v10, %v360_v9  ;;  %v359_v18 = vld [vmem:[#allocation9 + $0x310] sm:$0xff]  ;;  %v1327_v20 = vpack.c.bf16 %v365_v13, %v357_v12  ;;  %v376_v21 = vld [vmem:[#allocation9 + $0x398] sm:$0xff] }
  0x87   : > { %1382 = vmatprep.subr.bf16.mxu1 %v1381_v57  ;;  %v382_v16 = vld [vmem:[#allocation9 + $0x3c8] sm:$0xff]  ;;  %v367_v19 = vld [vmem:[#allocation9 + $0x350] sm:$0xff]  ;;  %v384_v22 = vld [vmem:[#allocation9 + $0x3d8] sm:$0xff]  ;;  %v522_v62 = vunpack.c.0.s8 %v521_v48 }
  0x88   : > { %v1329_v23 = vpack.c.bf16 %v382_v16, %v374_v15  ;;  %v373_v24 = vld [vmem:[#allocation9 + $0x380] sm:$0xff]  ;;  %v1391_v26 = vpack.c.bf16 %v367_v19, %v359_v18  ;;  %v390_v27 = vld [vmem:[#allocation9 + $0x408] sm:$0xff]  ;;  %v1393_v29 = vpack.c.bf16 %v384_v22, %v376_v21  ;;  %v375_v30 = vld [vmem:[#allocation9 + $0x390] sm:$0xff] }
  0x89   : > { %1320 = vmatpush1.bf16.msra.mxu0 %v1319_v60  ;;  %v381_v25 = vld [vmem:[#allocation9 + $0x3c0] sm:$0xff]  ;;  %v398_v28 = vld [vmem:[#allocation9 + $0x448] sm:$0xff]  ;;  %v383_v31 = vld [vmem:[#allocation9 + $0x3d0] sm:$0xff] }
  0x8a   : > { %1322 = vmatprep.subr.bf16.mxu0 %v1321_v63  ;;  %1384 = vmatpush1.bf16.msra.mxu1 %v1383_v2  ;;  %v1331_v32 = vpack.c.bf16 %v381_v25, %v373_v24  ;;  %v392_v33 = vld [vmem:[#allocation9 + $0x418] sm:$0xff]  ;;  %v1333_v35 = vpack.c.bf16 %v398_v28, %v390_v27  ;;  %v389_v36 = vld [vmem:[#allocation9 + $0x400] sm:$0xff]  ;;  %v1395_v38 = vpack.c.bf16 %v383_v31, %v375_v30  ;;  %v406_v39 = vld [vmem:[#allocation9 + $0x488] sm:$0xff]  ;;  %v524_v63 = vshrl.u32 %v523_v49, 7 }
  0x8b   : > { %1386 = vmatprep.subr.bf16.mxu1 %v1385_v5  ;;  %v400_v34 = vld [vmem:[#allocation9 + $0x458] sm:$0xff]  ;;  %v397_v37 = vld [vmem:[#allocation9 + $0x440] sm:$0xff]  ;;  %v414_v40 = vld [vmem:[#allocation9 + $0x4c8] sm:$0xff] }
  0x8c   : > { %v1397_v41 = vpack.c.bf16 %v400_v34, %v392_v33  ;;  %v391_v42 = vld [vmem:[#allocation9 + $0x410] sm:$0xff]  ;;  %v1335_v44 = vpack.c.bf16 %v397_v37, %v389_v36  ;;  %v408_v45 = vld [vmem:[#allocation9 + $0x498] sm:$0xff]  ;;  %v1337_v50 = vpack.c.bf16 %v414_v40, %v406_v39  ;;  %v405_v51 = vld [vmem:[#allocation9 + $0x480] sm:$0xff]  ;;  %v2057_v13 = vsub.s32 %v522_v62, %v524_v63 }
  0x8d   : > { %1324 = vmatpush1.bf16.msra.mxu0 %v1323_v8  ;;  %v399_v43 = vld [vmem:[#allocation9 + $0x450] sm:$0xff]  ;;  %v416_v46 = vld [vmem:[#allocation9 + $0x4d8] sm:$0xff]  ;;  %v413_v52 = vld [vmem:[#allocation9 + $0x4c0] sm:$0xff] }
  0x8e   : > { %1326 = vmatprep.subr.bf16.mxu0 %v1325_v11  ;;  %1388 = vmatpush1.bf16.msra.mxu1 %v1387_v14  ;;  %v1399_v53 = vpack.c.bf16 %v399_v43, %v391_v42  ;;  %v422_v54 = vld [vmem:[#allocation9 + $0x508] sm:$0xff]  ;;  %v1401_v56 = vpack.c.bf16 %v416_v46, %v408_v45  ;;  %v407_v57 = vld [vmem:[#allocation9 + $0x490] sm:$0xff]  ;;  %v1339_v59 = vpack.c.bf16 %v413_v52, %v405_v51  ;;  %v424_v60 = vld [vmem:[#allocation9 + $0x518] sm:$0xff] }
  0x8f   : > { %1390 = vmatprep.subr.bf16.mxu1 %v1389_v17  ;;  %v430_v55 = vld [vmem:[#allocation9 + $0x548] sm:$0xff]  ;;  %v415_v58 = vld [vmem:[#allocation9 + $0x4d0] sm:$0xff]  ;;  %v432_v61 = vld [vmem:[#allocation9 + $0x558] sm:$0xff] }
  0x90   : > { %v1341_v0 = vpack.c.bf16 %v430_v55, %v422_v54  ;;  %v421_v1 = vld [vmem:[#allocation9 + $0x500] sm:$0xff]  ;;  %v1403_v3 = vpack.c.bf16 %v415_v58, %v407_v57  ;;  %v438_v4 = vld [vmem:[#allocation9 + $0x588] sm:$0xff]  ;;  %v1405_v6 = vpack.c.bf16 %v432_v61, %v424_v60  ;;  %v423_v7 = vld [vmem:[#allocation9 + $0x510] sm:$0xff] }
  0x91   : > { %1328 = vmatpush1.bf16.msra.mxu0 %v1327_v20  ;;  %v429_v2 = vld [vmem:[#allocation9 + $0x540] sm:$0xff]  ;;  %v446_v5 = vld [vmem:[#allocation9 + $0x5c8] sm:$0xff]  ;;  %v431_v8 = vld [vmem:[#allocation9 + $0x550] sm:$0xff] }
  0x92   : > { %1330 = vmatprep.subr.bf16.mxu0 %v1329_v23  ;;  %1392 = vmatpush1.bf16.msra.mxu1 %v1391_v26  ;;  %v1343_v9 = vpack.c.bf16 %v429_v2, %v421_v1  ;;  %v437_v10 = vld [vmem:[#allocation9 + $0x580] sm:$0xff]  ;;  %v440_v11 = vld [vmem:[#allocation9 + $0x598] sm:$0xff]  ;;  %v1345_v14 = vpack.c.bf16 %v446_v5, %v438_v4  ;;  %v1407_v16 = vpack.c.bf16 %v431_v8, %v423_v7  ;;  %v454_v17 = vld [vmem:[#allocation9 + $0x608] sm:$0xff] }
  0x93   : > { %1394 = vmatprep.subr.bf16.mxu1 %v1393_v29  ;;  %v448_v12 = vld [vmem:[#allocation9 + $0x5d8] sm:$0xff]  ;;  %v445_v15 = vld [vmem:[#allocation9 + $0x5c0] sm:$0xff]  ;;  %v462_v18 = vld [vmem:[#allocation9 + $0x648] sm:$0xff] }
  0x94   : > { %v2060_v19 = vld.sshfl [vmem:[%s2047_s5] sm:$0xff pattern:$0x76325410]  ;;  %v1409_v20 = vpack.c.bf16 %v448_v12, %v440_v11  ;;  %v1347_v23 = vpack.c.bf16 %v445_v15, %v437_v10  ;;  %v1349_v26 = vpack.c.bf16 %v462_v18, %v454_v17  ;;  %v453_v27 = vld [vmem:[#allocation9 + $0x600] sm:$0xff]  ;;  %v470_v30 = vld [vmem:[#allocation9 + $0x688] sm:$0xff] }
  0x95   : > { %1332 = vmatpush1.bf16.msra.mxu0 %v1331_v32  ;;  %v439_v21 = vld [vmem:[#allocation9 + $0x590] sm:$0xff]  ;;  %v456_v24 = vld [vmem:[#allocation9 + $0x618] sm:$0xff]  ;;  %v461_v28 = vld [vmem:[#allocation9 + $0x640] sm:$0xff]  ;;  %v2064_v32 = vcombine.high %v2060_v19, %v2060_v19 }
  0x96   : > { %1334 = vmatprep.subr.bf16.mxu0 %v1333_v35  ;;  %1396 = vmatpush1.bf16.msra.mxu1 %v1395_v38  ;;  %v447_v22 = vld [vmem:[#allocation9 + $0x5d0] sm:$0xff]  ;;  %v464_v25 = vld [vmem:[#allocation9 + $0x658] sm:$0xff]  ;;  %v478_v31 = vld [vmem:[#allocation9 + $0x6c8] sm:$0xff]  ;;  %v1351_v36 = vpack.c.bf16 %v461_v28, %v453_v27 }
  0x97   : > { %1398 = vmatprep.subr.bf16.mxu1 %v1397_v41  ;;  %v1411_v29 = vpack.c.bf16 %v447_v22, %v439_v21  ;;  %v1413_v33 = vpack.c.bf16 %v464_v25, %v456_v24  ;;  %v455_v34 = vld [vmem:[#allocation9 + $0x610] sm:$0xff]  ;;  %v472_v37 = vld [vmem:[#allocation9 + $0x698] sm:$0xff]  ;;  %594 = vmatprep.mubr.f32.mxu0 %v2064_v32  ;;  %v1353_v39 = vpack.c.bf16 %v478_v31, %v470_v30  ;;  %v469_v40 = vld [vmem:[#allocation9 + $0x680] sm:$0xff] }
  0x98   : > { %v463_v35 = vld [vmem:[#allocation9 + $0x650] sm:$0xff]  ;;  %v480_v38 = vld [vmem:[#allocation9 + $0x6d8] sm:$0xff]  ;;  %v477_v41 = vld [vmem:[#allocation9 + $0x6c0] sm:$0xff]  ;;  %665 = vmatprep.mubr.f32.mxu1 %v2064_v32 }
  0x99   : > { %1336 = vmatpush1.bf16.msra.mxu0 %v1335_v44  ;;  %v1415_v42 = vpack.c.bf16 %v463_v35, %v455_v34  ;;  %v486_v43 = vld [vmem:[#allocation9 + $0x708] sm:$0xff]  ;;  %v1417_v45 = vpack.c.bf16 %v480_v38, %v472_v37  ;;  %v471_v46 = vld [vmem:[#allocation9 + $0x690] sm:$0xff]  ;;  %v1355_v48 = vpack.c.bf16 %v477_v41, %v469_v40  ;;  %v488_v49 = vld [vmem:[#allocation9 + $0x718] sm:$0xff] }
  0x9a   : > { %1338 = vmatprep.subr.bf16.mxu0 %v1337_v50  ;;  %1400 = vmatpush1.bf16.msra.mxu1 %v1399_v53  ;;  %v494_v44 = vld [vmem:[#allocation9 + $0x748] sm:$0xff]  ;;  %v479_v47 = vld [vmem:[#allocation9 + $0x6d0] sm:$0xff]  ;;  %v496_v50 = vld [vmem:[#allocation9 + $0x758] sm:$0xff] }
  0x9b   : > { %1402 = vmatprep.subr.bf16.mxu1 %v1401_v56  ;;  %v1357_v51 = vpack.c.bf16 %v494_v44, %v486_v43  ;;  %v485_v52 = vld [vmem:[#allocation9 + $0x700] sm:$0xff]  ;;  %v1419_v54 = vpack.c.bf16 %v479_v47, %v471_v46  ;;  %v502_v55 = vld [vmem:[#allocation9 + $0x788] sm:$0xff]  ;;  %v1421_v57 = vpack.c.bf16 %v496_v50, %v488_v49  ;;  %v487_v58 = vld [vmem:[#allocation9 + $0x710] sm:$0xff] }
  0x9c   : > { %v493_v53 = vld [vmem:[#allocation9 + $0x740] sm:$0xff]  ;;  %v510_v56 = vld [vmem:[#allocation9 + $0x7c8] sm:$0xff]  ;;  %v504_v61 = vld [vmem:[#allocation9 + $0x798] sm:$0xff] }
  0x9d   : > { %1340 = vmatpush1.bf16.msra.mxu0 %v1339_v59  ;;  %v495_v59 = vld [vmem:[#allocation9 + $0x750] sm:$0xff]  ;;  %v1359_v60 = vpack.c.bf16 %v493_v53, %v485_v52  ;;  %v512_v62 = vld [vmem:[#allocation9 + $0x7d8] sm:$0xff]  ;;  %v1361_v63 = vpack.c.bf16 %v510_v56, %v502_v55  ;;  %v509_v1 = vld [vmem:[#allocation9 + $0x7c0] sm:$0xff] }
  0x9e   : > { %1342 = vmatprep.subr.bf16.mxu0 %v1341_v0  ;;  %1404 = vmatpush1.bf16.msra.mxu1 %v1403_v3  ;;  %v501_v0 = vld [vmem:[#allocation9 + $0x780] sm:$0xff]  ;;  %v1423_v2 = vpack.c.bf16 %v495_v59, %v487_v58  ;;  %v266_v3 = vld [vmem:[#allocation9 + $0x28] sm:$0xff]  ;;  %v1425_v5 = vpack.c.bf16 %v512_v62, %v504_v61  ;;  %v511_v7 = vld [vmem:[#allocation9 + $0x7d0] sm:$0xff] }
  0x9f   : > { %1406 = vmatprep.subr.bf16.mxu1 %v1405_v6  ;;  %v274_v4 = vld [vmem:[#allocation9 + $0x68] sm:$0xff]  ;;  %v503_v6 = vld [vmem:[#allocation9 + $0x790] sm:$0xff]  ;;  %v1363_v8 = vpack.c.bf16 %v509_v1, %v501_v0  ;;  %v276_v10 = vld [vmem:[#allocation9 + $0x78] sm:$0xff] }
  0xa0   : > { %v1429_v11 = vpack.c.bf16 %v274_v4, %v266_v3  ;;  %v265_v12 = vld [vmem:[#allocation9 + $0x20] sm:$0xff]  ;;  %v1427_v15 = vpack.c.bf16 %v511_v7, %v503_v6  ;;  %v290_v17 = vld [vmem:[#allocation9 + $0xe8] sm:$0xff]  ;;  %v275_v21 = vld [vmem:[#allocation9 + $0x70] sm:$0xff] }
  0xa1   : > { %1344 = vmatpush1.bf16.msra.mxu0 %v1343_v9  ;;  %v268_v9 = vld [vmem:[#allocation9 + $0x38] sm:$0xff]  ;;  %v289_v27 = vld [vmem:[#allocation9 + $0xe0] sm:$0xff]  ;;  %v306_v30 = vld [vmem:[#allocation9 + $0x168] sm:$0xff] }
  0xa2   : > { %1346 = vmatprep.subr.bf16.mxu0 %v1345_v14  ;;  %1408 = vmatpush1.bf16.msra.mxu1 %v1407_v16  ;;  %v273_v14 = vld [vmem:[#allocation9 + $0x60] sm:$0xff]  ;;  %v282_v16 = vld [vmem:[#allocation9 + $0xa8] sm:$0xff]  ;;  %v1493_v18 = vpack.c.bf16 %v276_v10, %v268_v9  ;;  %v292_v24 = vld [vmem:[#allocation9 + $0xf8] sm:$0xff] }
  0xa3   : > { %1410 = vmatprep.subr.bf16.mxu1 %v1409_v20  ;;  %v267_v20 = vld [vmem:[#allocation9 + $0x30] sm:$0xff]  ;;  %v1431_v22 = vpack.c.bf16 %v273_v14, %v265_v12  ;;  %v1433_v25 = vpack.c.bf16 %v290_v17, %v282_v16  ;;  %v308_v37 = vld [vmem:[#allocation9 + $0x178] sm:$0xff]  ;;  %v305_v40 = vld [vmem:[#allocation9 + $0x160] sm:$0xff] }
  0xa4   : > { %v1495_v28 = vpack.c.bf16 %v275_v21, %v267_v20  ;;  %v291_v34 = vld [vmem:[#allocation9 + $0xf0] sm:$0xff]  ;;  %v322_v43 = vld [vmem:[#allocation9 + $0x1e8] sm:$0xff]  ;;  %v324_v49 = vld [vmem:[#allocation9 + $0x1f8] sm:$0xff] }
  0xa5   : > { %1348 = vmatpush1.bf16.msra.mxu0 %v1347_v23  ;;  %v284_v23 = vld [vmem:[#allocation9 + $0xb8] sm:$0xff]  ;;  %v307_v46 = vld [vmem:[#allocation9 + $0x170] sm:$0xff]  ;;  %v321_v52 = vld [vmem:[#allocation9 + $0x1e0] sm:$0xff] }
  0xa6   : > { %1350 = vmatprep.subr.bf16.mxu0 %v1349_v26  ;;  %1412 = vmatpush1.bf16.msra.mxu1 %v1411_v29  ;;  %v281_v26 = vld [vmem:[#allocation9 + $0xa0] sm:$0xff]  ;;  %v298_v29 = vld [vmem:[#allocation9 + $0x128] sm:$0xff]  ;;  %v1497_v31 = vpack.c.bf16 %v292_v24, %v284_v23  ;;  %v332_v59 = vld [vmem:[#allocation9 + $0x238] sm:$0xff] }
  0xa7   : > { %1414 = vmatprep.subr.bf16.mxu1 %v1413_v33  ;;  %v283_v33 = vld [vmem:[#allocation9 + $0xb0] sm:$0xff]  ;;  %v1435_v35 = vpack.c.bf16 %v289_v27, %v281_v26  ;;  %v1437_v38 = vpack.c.bf16 %v306_v30, %v298_v29  ;;  %v338_v55 = vld [vmem:[#allocation9 + $0x268] sm:$0xff]  ;;  %v329_v62 = vld [vmem:[#allocation9 + $0x220] sm:$0xff] }
  0xa8   : > { %v1499_v41 = vpack.c.bf16 %v291_v34, %v283_v33  ;;  %v346_v1 = vld [vmem:[#allocation9 + $0x2a8] sm:$0xff]  ;;  %v331_v4 = vld [vmem:[#allocation9 + $0x230] sm:$0xff]  ;;  %v348_v7 = vld [vmem:[#allocation9 + $0x2b8] sm:$0xff] }
  0xa9   : > { %1352 = vmatpush1.bf16.msra.mxu0 %v1351_v36  ;;  %v300_v36 = vld [vmem:[#allocation9 + $0x138] sm:$0xff]  ;;  %v345_v10 = vld [vmem:[#allocation9 + $0x2a0] sm:$0xff]  ;;  %v362_v14 = vld [vmem:[#allocation9 + $0x328] sm:$0xff] }
  0xaa   : > { %1354 = vmatprep.subr.bf16.mxu0 %v1353_v39  ;;  %1416 = vmatpush1.bf16.msra.mxu1 %v1415_v42  ;;  %v297_v39 = vld [vmem:[#allocation9 + $0x120] sm:$0xff]  ;;  %v314_v42 = vld [vmem:[#allocation9 + $0x1a8] sm:$0xff]  ;;  %v1501_v44 = vpack.c.bf16 %v308_v37, %v300_v36  ;;  %v347_v17 = vld [vmem:[#allocation9 + $0x2b0] sm:$0xff] }
  0xab   : > { %1418 = vmatprep.subr.bf16.mxu1 %v1417_v45  ;;  %v299_v45 = vld [vmem:[#allocation9 + $0x130] sm:$0xff]  ;;  %v1439_v47 = vpack.c.bf16 %v305_v40, %v297_v39  ;;  %v1441_v50 = vpack.c.bf16 %v322_v43, %v314_v42  ;;  %v364_v21 = vld [vmem:[#allocation9 + $0x338] sm:$0xff]  ;;  %v361_v24 = vld [vmem:[#allocation9 + $0x320] sm:$0xff] }
  0xac   : > { %v1503_v53 = vpack.c.bf16 %v307_v46, %v299_v45  ;;  %v378_v27 = vld [vmem:[#allocation9 + $0x3a8] sm:$0xff]  ;;  %v363_v30 = vld [vmem:[#allocation9 + $0x330] sm:$0xff]  ;;  %v380_v34 = vld [vmem:[#allocation9 + $0x3b8] sm:$0xff] }
  0xad   : > { %1356 = vmatpush1.bf16.msra.mxu0 %v1355_v48  ;;  %v316_v48 = vld [vmem:[#allocation9 + $0x1b8] sm:$0xff]  ;;  %v377_v37 = vld [vmem:[#allocation9 + $0x3a0] sm:$0xff]  ;;  %v394_v40 = vld [vmem:[#allocation9 + $0x428] sm:$0xff] }
  0xae   : > { %1358 = vmatprep.subr.bf16.mxu0 %v1357_v51  ;;  %1420 = vmatpush1.bf16.msra.mxu1 %v1419_v54  ;;  %v313_v51 = vld [vmem:[#allocation9 + $0x1a0] sm:$0xff]  ;;  %v330_v54 = vld [vmem:[#allocation9 + $0x228] sm:$0xff]  ;;  %v1505_v56 = vpack.c.bf16 %v324_v49, %v316_v48  ;;  %v379_v43 = vld [vmem:[#allocation9 + $0x3b0] sm:$0xff] }
  0xaf   : > { %1422 = vmatprep.subr.bf16.mxu1 %v1421_v57  ;;  %v315_v57 = vld [vmem:[#allocation9 + $0x1b0] sm:$0xff]  ;;  %v1443_v58 = vpack.c.bf16 %v321_v52, %v313_v51  ;;  %v1445_v61 = vpack.c.bf16 %v338_v55, %v330_v54  ;;  %v396_v46 = vld [vmem:[#allocation9 + $0x438] sm:$0xff]  ;;  %v393_v49 = vld [vmem:[#allocation9 + $0x420] sm:$0xff] }
  0xb0   : > { %v410_v52 = vld [vmem:[#allocation9 + $0x4a8] sm:$0xff]  ;;  %v395_v55 = vld [vmem:[#allocation9 + $0x430] sm:$0xff] }
  0xb1   : > { %1360 = vmatpush1.bf16.msra.mxu0 %v1359_v60  ;;  %v340_v60 = vld [vmem:[#allocation9 + $0x278] sm:$0xff] }
  0xb2   : > { %1362 = vmatprep.subr.bf16.mxu0 %v1361_v63  ;;  %1424 = vmatpush1.bf16.msra.mxu1 %v1423_v2  ;;  %v337_v63 = vld [vmem:[#allocation9 + $0x260] sm:$0xff]  ;;  %v354_v2 = vld [vmem:[#allocation9 + $0x2e8] sm:$0xff]  ;;  %v1509_v3 = vpack.c.bf16 %v340_v60, %v332_v59 }
  0xb3   : > { %1426 = vmatprep.subr.bf16.mxu1 %v1425_v5  ;;  %v339_v5 = vld [vmem:[#allocation9 + $0x270] sm:$0xff]  ;;  %v1447_v6 = vpack.c.bf16 %v337_v63, %v329_v62  ;;  %v1449_v9 = vpack.c.bf16 %v354_v2, %v346_v1  ;;  %v409_v60 = vld [vmem:[#allocation9 + $0x4a0] sm:$0xff]  ;;  %v426_v63 = vld [vmem:[#allocation9 + $0x528] sm:$0xff] }
  0xb4   : > { %v1511_v12 = vpack.c.bf16 %v339_v5, %v331_v4  ;;  %v411_v2 = vld [vmem:[#allocation9 + $0x4b0] sm:$0xff]  ;;  %v428_v5 = vld [vmem:[#allocation9 + $0x538] sm:$0xff] }
  0xb5   : > { %1364 = vmatpush1.bf16.msra.mxu0 %v1363_v8  ;;  %v356_v8 = vld [vmem:[#allocation9 + $0x2f8] sm:$0xff] }
  0xb6   : > { %1430 = vmatprep.subr.bf16.mxu0 %v1429_v11  ;;  %1428 = vmatpush1.bf16.msra.mxu1 %v1427_v15  ;;  %v353_v11 = vld [vmem:[#allocation9 + $0x2e0] sm:$0xff]  ;;  %v370_v15 = vld [vmem:[#allocation9 + $0x368] sm:$0xff]  ;;  %v1513_v16 = vpack.c.bf16 %v356_v8, %v348_v7 }
  0xb7   : > { %1494 = vmatprep.subr.bf16.mxu1 %v1493_v18  ;;  %v355_v18 = vld [vmem:[#allocation9 + $0x2f0] sm:$0xff]  ;;  %v1451_v20 = vpack.c.bf16 %v353_v11, %v345_v10  ;;  %v1453_v23 = vpack.c.bf16 %v370_v15, %v362_v14  ;;  %v425_v8 = vld [vmem:[#allocation9 + $0x520] sm:$0xff]  ;;  %v442_v11 = vld [vmem:[#allocation9 + $0x5a8] sm:$0xff] }
  0xb8   : > { %595 = vmatmul.mubr.f32.vlgmr.msra.gmra.mrb[0].mxu0 %v2060_v19  ;;  %v1515_v26 = vpack.c.bf16 %v355_v18, %v347_v17  ;;  %v427_v15 = vld [vmem:[#allocation9 + $0x530] sm:$0xff]  ;;  %v444_v18 = vld [vmem:[#allocation9 + $0x5b8] sm:$0xff] }
  0xb9   : > { %1432 = vmatpush1.bf16.msra.mxu0 %v1431_v22  ;;  %736 = vmatprep.mubr.f32.mxu0 %v2064_v32  ;;  %v372_v22 = vld [vmem:[#allocation9 + $0x378] sm:$0xff] }
  0xba   : > { %666 = vmatmul.mubr.f32.vlgmr.msra.gmra.mrb[0].mxu1 %v2060_v19  ;;  %1434 = vmatprep.subr.bf16.mxu0 %v1433_v25  ;;  %v369_v25 = vld [vmem:[#allocation9 + $0x360] sm:$0xff]  ;;  %v1517_v29 = vpack.c.bf16 %v372_v22, %v364_v21 }
  0xbb   : > { %1496 = vmatpush1.bf16.msra.mxu1 %v1495_v28  ;;  %807 = vmatprep.mubr.f32.mxu1 %v2064_v32  ;;  %v323_v32 = vld [vmem:[#allocation9 + $0x1f0] sm:$0xff]  ;;  %v386_v28 = vld [vmem:[#allocation9 + $0x3e8] sm:$0xff]  ;;  %v1455_v33 = vpack.c.bf16 %v369_v25, %v361_v24  ;;  %v441_v22 = vld [vmem:[#allocation9 + $0x5a0] sm:$0xff] }
  0xbc   : > { %1498 = vmatprep.subr.bf16.mxu1 %v1497_v31  ;;  %v1507_v0 = vpack.c.bf16 %v323_v32, %v315_v57  ;;  %v371_v31 = vld [vmem:[#allocation9 + $0x370] sm:$0xff]  ;;  %v1457_v36 = vpack.c.bf16 %v386_v28, %v378_v27  ;;  %v412_v32 = vld [vmem:[#allocation9 + $0x4b8] sm:$0xff]  ;;  %v458_v25 = vld [vmem:[#allocation9 + $0x628] sm:$0xff] }
  0xbd   : > { %1436 = vmatpush1.bf16.msra.mxu0 %v1435_v35  ;;  %v388_v35 = vld [vmem:[#allocation9 + $0x3f8] sm:$0xff]  ;;  %v1519_v39 = vpack.c.bf16 %v371_v31, %v363_v30  ;;  %v443_v28 = vld [vmem:[#allocation9 + $0x5b0] sm:$0xff] }
  0xbe   : > { %1438 = vmatprep.subr.bf16.mxu0 %v1437_v38  ;;  %v385_v38 = vld [vmem:[#allocation9 + $0x3e0] sm:$0xff]  ;;  %v1521_v42 = vpack.c.bf16 %v388_v35, %v380_v34  ;;  %v460_v31 = vld [vmem:[#allocation9 + $0x638] sm:$0xff] }
  0xbf   : > { %1500 = vmatpush1.bf16.msra.mxu1 %v1499_v41  ;;  %v402_v41 = vld [vmem:[#allocation9 + $0x468] sm:$0xff]  ;;  %v1459_v45 = vpack.c.bf16 %v385_v38, %v377_v37  ;;  %v457_v35 = vld [vmem:[#allocation9 + $0x620] sm:$0xff] }
  0xc0   : > { %1502 = vmatprep.subr.bf16.mxu1 %v1501_v44  ;;  %v387_v44 = vld [vmem:[#allocation9 + $0x3f0] sm:$0xff]  ;;  %v1461_v48 = vpack.c.bf16 %v402_v41, %v394_v40  ;;  %v474_v38 = vld [vmem:[#allocation9 + $0x6a8] sm:$0xff] }
  0xc1   : > { %1440 = vmatpush1.bf16.msra.mxu0 %v1439_v47  ;;  %v404_v47 = vld [vmem:[#allocation9 + $0x478] sm:$0xff]  ;;  %v1523_v51 = vpack.c.bf16 %v387_v44, %v379_v43  ;;  %v459_v41 = vld [vmem:[#allocation9 + $0x630] sm:$0xff] }
  0xc2   : > { %1442 = vmatprep.subr.bf16.mxu0 %v1441_v50  ;;  %v401_v50 = vld [vmem:[#allocation9 + $0x460] sm:$0xff]  ;;  %v1525_v54 = vpack.c.bf16 %v404_v47, %v396_v46  ;;  %v476_v44 = vld [vmem:[#allocation9 + $0x6b8] sm:$0xff] }
  0xc3   : > { %1504 = vmatpush1.bf16.msra.mxu1 %v1503_v53  ;;  %v418_v53 = vld [vmem:[#allocation9 + $0x4e8] sm:$0xff]  ;;  %v1463_v57 = vpack.c.bf16 %v401_v50, %v393_v49  ;;  %v473_v47 = vld [vmem:[#allocation9 + $0x6a0] sm:$0xff] }
  0xc4   : > { %1506 = vmatprep.subr.bf16.mxu1 %v1505_v56  ;;  %v403_v56 = vld [vmem:[#allocation9 + $0x470] sm:$0xff]  ;;  %v1465_v59 = vpack.c.bf16 %v418_v53, %v410_v52  ;;  %v490_v50 = vld [vmem:[#allocation9 + $0x728] sm:$0xff] }
  0xc5   : > { %1444 = vmatpush1.bf16.msra.mxu0 %v1443_v58  ;;  %v420_v58 = vld [vmem:[#allocation9 + $0x4f8] sm:$0xff]  ;;  %v1527_v62 = vpack.c.bf16 %v403_v56, %v395_v55  ;;  %v475_v53 = vld [vmem:[#allocation9 + $0x6b0] sm:$0xff] }
  0xc6   : > { %1446 = vmatprep.subr.bf16.mxu0 %v1445_v61  ;;  %v417_v61 = vld [vmem:[#allocation9 + $0x4e0] sm:$0xff]  ;;  %v1529_v1 = vpack.c.bf16 %v420_v58, %v412_v32  ;;  %v492_v56 = vld [vmem:[#allocation9 + $0x738] sm:$0xff] }
  0xc7   : > { %1508 = vmatpush1.bf16.msra.mxu1 %v1507_v0  ;;  %v434_v0 = vld [vmem:[#allocation9 + $0x568] sm:$0xff]  ;;  %v1467_v4 = vpack.c.bf16 %v417_v61, %v409_v60  ;;  %v489_v58 = vld [vmem:[#allocation9 + $0x720] sm:$0xff] }
  0xc8   : > { %1510 = vmatprep.subr.bf16.mxu1 %v1509_v3  ;;  %v419_v3 = vld [vmem:[#allocation9 + $0x4f0] sm:$0xff]  ;;  %v1469_v7 = vpack.c.bf16 %v434_v0, %v426_v63  ;;  %v506_v61 = vld [vmem:[#allocation9 + $0x7a8] sm:$0xff] }
  0xc9   : > { %1448 = vmatpush1.bf16.msra.mxu0 %v1447_v6  ;;  %v436_v6 = vld [vmem:[#allocation9 + $0x578] sm:$0xff]  ;;  %v1531_v10 = vpack.c.bf16 %v419_v3, %v411_v2  ;;  %v491_v0 = vld [vmem:[#allocation9 + $0x730] sm:$0xff] }
  0xca   : > { %1450 = vmatprep.subr.bf16.mxu0 %v1449_v9  ;;  %v433_v9 = vld [vmem:[#allocation9 + $0x560] sm:$0xff]  ;;  %v1533_v14 = vpack.c.bf16 %v436_v6, %v428_v5  ;;  %v508_v3 = vld [vmem:[#allocation9 + $0x7b8] sm:$0xff] }
  0xcb   : > { %1512 = vmatpush1.bf16.msra.mxu1 %v1511_v12  ;;  %v450_v12 = vld [vmem:[#allocation9 + $0x5e8] sm:$0xff]  ;;  %v1471_v17 = vpack.c.bf16 %v433_v9, %v425_v8  ;;  %v505_v6 = vld [vmem:[#allocation9 + $0x7a0] sm:$0xff] }
  0xcc   : > { %1514 = vmatprep.subr.bf16.mxu1 %v1513_v16  ;;  %v435_v16 = vld [vmem:[#allocation9 + $0x570] sm:$0xff]  ;;  %v1473_v21 = vpack.c.bf16 %v450_v12, %v442_v11 }
  0xcd   : > { %1452 = vmatpush1.bf16.msra.mxu0 %v1451_v20  ;;  %v452_v20 = vld [vmem:[#allocation9 + $0x5f8] sm:$0xff]  ;;  %v1535_v24 = vpack.c.bf16 %v435_v16, %v427_v15  ;;  %v515_v11 = vld [vmem:[#allocation9 + $0x7f0] sm:$0xff] }
  0xce   : > { %1454 = vmatprep.subr.bf16.mxu0 %v1453_v23  ;;  %v449_v23 = vld [vmem:[#allocation9 + $0x5e0] sm:$0xff]  ;;  %v1537_v27 = vpack.c.bf16 %v452_v20, %v444_v18 }
  0xcf   : > { %1516 = vmatpush1.bf16.msra.mxu1 %v1515_v26  ;;  %v466_v26 = vld [vmem:[#allocation9 + $0x668] sm:$0xff]  ;;  %v1475_v30 = vpack.c.bf16 %v449_v23, %v441_v22 }
  0xd0   : > { %1518 = vmatprep.subr.bf16.mxu1 %v1517_v29  ;;  %v451_v29 = vld [vmem:[#allocation9 + $0x5f0] sm:$0xff]  ;;  %v1477_v34 = vpack.c.bf16 %v466_v26, %v458_v25 }
  0xd1   : > { %1456 = vmatpush1.bf16.msra.mxu0 %v1455_v33  ;;  %v468_v33 = vld [vmem:[#allocation9 + $0x678] sm:$0xff]  ;;  %v1539_v37 = vpack.c.bf16 %v451_v29, %v443_v28 }
  0xd2   : > { %1458 = vmatprep.subr.bf16.mxu0 %v1457_v36  ;;  %v465_v36 = vld [vmem:[#allocation9 + $0x660] sm:$0xff]  ;;  %v1541_v40 = vpack.c.bf16 %v468_v33, %v460_v31 }
  0xd3   : > { %1520 = vmatpush1.bf16.msra.mxu1 %v1519_v39  ;;  %v482_v39 = vld [vmem:[#allocation9 + $0x6e8] sm:$0xff]  ;;  %v1479_v43 = vpack.c.bf16 %v465_v36, %v457_v35 }
  0xd4   : > { %1522 = vmatprep.subr.bf16.mxu1 %v1521_v42  ;;  %v467_v42 = vld [vmem:[#allocation9 + $0x670] sm:$0xff]  ;;  %v1481_v46 = vpack.c.bf16 %v482_v39, %v474_v38 }
  0xd5   : > { %1460 = vmatpush1.bf16.msra.mxu0 %v1459_v45  ;;  %v484_v45 = vld [vmem:[#allocation9 + $0x6f8] sm:$0xff]  ;;  %v1543_v49 = vpack.c.bf16 %v467_v42, %v459_v41 }
  0xd6   : > { %1462 = vmatprep.subr.bf16.mxu0 %v1461_v48  ;;  %v481_v48 = vld [vmem:[#allocation9 + $0x6e0] sm:$0xff]  ;;  %v1545_v52 = vpack.c.bf16 %v484_v45, %v476_v44 }
  0xd7   : > { %1524 = vmatpush1.bf16.msra.mxu1 %v1523_v51  ;;  %v498_v51 = vld [vmem:[#allocation9 + $0x768] sm:$0xff]  ;;  %v1483_v55 = vpack.c.bf16 %v481_v48, %v473_v47 }
  0xd8   : > { %1526 = vmatprep.subr.bf16.mxu1 %v1525_v54  ;;  %v483_v54 = vld [vmem:[#allocation9 + $0x6f0] sm:$0xff]  ;;  %v1485_v32 = vpack.c.bf16 %v498_v51, %v490_v50 }
  0xd9   : > { %1464 = vmatpush1.bf16.msra.mxu0 %v1463_v57  ;;  %v500_v57 = vld [vmem:[#allocation9 + $0x778] sm:$0xff]  ;;  %v1547_v60 = vpack.c.bf16 %v483_v54, %v475_v53 }
  0xda   : > { %1466 = vmatprep.subr.bf16.mxu0 %v1465_v59  ;;  %v497_v59 = vld [vmem:[#allocation9 + $0x760] sm:$0xff]  ;;  %v1549_v63 = vpack.c.bf16 %v500_v57, %v492_v56 }
  0xdb   : > { %1528 = vmatpush1.bf16.msra.mxu1 %v1527_v62  ;;  %v514_v62 = vld [vmem:[#allocation9 + $0x7e8] sm:$0xff]  ;;  %v1487_v2 = vpack.c.bf16 %v497_v59, %v489_v58 }
  0xdc   : > { %1530 = vmatprep.subr.bf16.mxu1 %v1529_v1  ;;  %v499_v1 = vld [vmem:[#allocation9 + $0x770] sm:$0xff]  ;;  %v1489_v5 = vpack.c.bf16 %v514_v62, %v506_v61 }
  0xdd   : > { %1468 = vmatpush1.bf16.msra.mxu0 %v1467_v4  ;;  %v516_v4 = vld [vmem:[#allocation9 + $0x7f8] sm:$0xff]  ;;  %v1551_v8 = vpack.c.bf16 %v499_v1, %v491_v0 }
  0xde   : > { %1470 = vmatprep.subr.bf16.mxu0 %v1469_v7  ;;  %v513_v7 = vld [vmem:[#allocation9 + $0x7e0] sm:$0xff]  ;;  %v1553_v9 = vpack.c.bf16 %v516_v4, %v508_v3 }
  0xdf   : > { %1532 = vmatpush1.bf16.msra.mxu1 %v1531_v10  ;;  %v507_v10 = vld [vmem:[#allocation9 + $0x7b0] sm:$0xff]  ;;  %v1491_v12 = vpack.c.bf16 %v513_v7, %v505_v6 }
  0xe0   : > { %1534 = vmatprep.subr.bf16.mxu1 %v1533_v14  ;;  %v1555_v14 = vpack.c.bf16 %v515_v11, %v507_v10 }
  0xe1   : > { %1472 = vmatpush1.bf16.msra.mxu0 %v1471_v17 }
  0xe2   : > { %1474 = vmatprep.subr.bf16.mxu0 %v1473_v21 }
  0xe3   : > { %1536 = vmatpush1.bf16.msra.mxu1 %v1535_v24 }
  0xe4   : > { %1538 = vmatprep.subr.bf16.mxu1 %v1537_v27 }
  0xe5   : > { %1476 = vmatpush1.bf16.msra.mxu0 %v1475_v30 }
  0xe6   : > { %1478 = vmatprep.subr.bf16.mxu0 %v1477_v34 }
  0xe7   : > { %1540 = vmatpush1.bf16.msra.mxu1 %v1539_v37 }
  0xe8   : > { %1542 = vmatprep.subr.bf16.mxu1 %v1541_v40 }
  0xe9   : > { %1480 = vmatpush1.bf16.msra.mxu0 %v1479_v43 }
  0xea   : > { %1482 = vmatprep.subr.bf16.mxu0 %v1481_v46 }
  0xeb   : > { %1544 = vmatpush1.bf16.msra.mxu1 %v1543_v49 }
  0xec   : > { %1546 = vmatprep.subr.bf16.mxu1 %v1545_v52 }
  0xed   : > { %1484 = vmatpush1.bf16.msra.mxu0 %v1483_v55 }
  0xee   : > { %1486 = vmatprep.subr.bf16.mxu0 %v1485_v32 }
  0xef   : > { %1548 = vmatpush1.bf16.msra.mxu1 %v1547_v60 }
  0xf0   : > { %1550 = vmatprep.subr.bf16.mxu1 %v1549_v63 }
  0xf1   : > { %1488 = vmatpush1.bf16.msra.mxu0 %v1487_v2 }
  0xf2   : > { %1490 = vmatprep.subr.bf16.mxu0 %v1489_v5 }
  0xf3   : > { %1552 = vmatpush1.bf16.msra.mxu1 %v1551_v8 }
  0xf4   : > { %1554 = vmatprep.subr.bf16.mxu1 %v1553_v9 }
  0xf5   : > { %1492 = vmatpush1.bf16.msra.mxu0 %v1491_v12 }
  0xf7   : > { %1556 = vmatpush1.bf16.msra.mxu1 %v1555_v14 }
  0xf8   : > { %737 = vmatmul.mubr.f32.vlgmr.msra.gmra.mrb[2].mxu0 %v2060_v19 }
  0xfa   : > { %808 = vmatmul.mubr.f32.vlgmr.msra.gmra.mrb[2].mxu1 %v2060_v19 }
 0x18b   : > { %v2074_v15 = vpop.f32.mrb[0].mxu0 }
 0x18c   : > { %v815_v16 = vsel %vm814_vm0, %v2074_v15, 0.0  ;;  %v839_v17 = vmul.f32 %v2074_v15, %v2074_v15  ;;  %v970_v18 = vrot.slane %v2074_v15, 2  ;;  %v2081_v20 = vpop.f32.mrb[1].mxu0 }
 0x18d   : > { %v816_v21 = vsel %vm814_vm0, %v2081_v20, 0.0  ;;  %v840_v22 = vmul.f32 %v2081_v20, %v2081_v20  ;;  %v971_v19 = vrot.slane %v2081_v20, 2  ;;  %v2088_v23 = vpop.f32.mrb[0].mxu1 }
 0x18e   : > { %v847_v24 = vsel %vm814_vm0, %v839_v17, 0.0  ;;  %v986_v25 = vsel %vm814_vm0, %v970_v18, 0.0  ;;  %v1018_v26 = vrot.slane %v839_v17, 2  ;;  %v817_v27 = vadd.f32 %v816_v21, %v815_v16  ;;  %v2092_v28 = vpop.f32.mrb[1].mxu1 }
 0x18f   : > { %v848_v29 = vsel %vm814_vm0, %v840_v22, 0.0  ;;  %v987_v30 = vsel %vm814_vm0, %v971_v19, 0.0  ;;  %v1019_v31 = vrot.slane %v840_v22, 2  ;;  %v818_v33 = vsel %vm814_vm0, %v2088_v23, 0.0 }
 0x190   : > { %v1034_v34 = vsel %vm814_vm0, %v1018_v26, 0.0  ;;  %v849_v35 = vadd.f32 %v848_v29, %v847_v24  ;;  %v988_v36 = vadd.f32 %v987_v30, %v986_v25  ;;  %v819_v37 = vadd.f32 %v818_v33, %v817_v27 }
 0x191   : > { %v1035_v38 = vsel %vm814_vm0, %v1019_v31, 0.0  ;;  %v841_v39 = vmul.f32 %v2088_v23, %v2088_v23  ;;  %v972_v40 = vrot.slane %v2088_v23, 2  ;;  %v820_v41 = vsel %vm814_vm0, %v2092_v28, 0.0 }
 0x192   : > { %v842_v42 = vmul.f32 %v2092_v28, %v2092_v28  ;;  %v973_v43 = vrot.slane %v2092_v28, 2  ;;  %v821_v44 = vadd.f32 %v820_v41, %v819_v37  ;;  %v1036_v45 = vadd.f32 %v1035_v38, %v1034_v34 }
 0x193   : > { %v850_v46 = vsel %vm814_vm0, %v841_v39, 0.0  ;;  %v989_v47 = vsel %vm814_vm0, %v972_v40, 0.0  ;;  %v1020_v48 = vrot.slane %v841_v39, 2 }
 0x194   : > { %v1021_v49 = vrot.slane %v842_v42, 2  ;;  %v990_v50 = vadd.f32 %v989_v47, %v988_v36  ;;  %v991_v51 = vsel %vm814_vm0, %v973_v43, 0.0  ;;  %v851_v52 = vadd.f32 %v850_v46, %v849_v35 }
 0x195   : > { %v852_v53 = vsel %vm814_vm0, %v842_v42, 0.0  ;;  %v1037_v54 = vsel %vm814_vm0, %v1020_v48, 0.0 }
 0x196   : > { %v992_v55 = vadd.f32 %v991_v51, %v990_v50  ;;  %v853_v56 = vadd.f32 %v852_v53, %v851_v52  ;;  %v1038_v57 = vadd.f32 %v1037_v54, %v1036_v45  ;;  %v1039_v32 = vsel %vm814_vm0, %v1021_v49, 0.0 }
 0x198   : > { %v1040_v58 = vadd.f32 %v1039_v32, %v1038_v57 }
 0x1cb   : > { %v2114_v59 = vpop.f32.mrb[2].mxu0 }
 0x1cc   : > { %v843_v60 = vmul.f32 %v2114_v59, %v2114_v59  ;;  %v974_v61 = vrot.slane %v2114_v59, 2  ;;  %v2119_v62 = vpop.f32.mrb[3].mxu0  ;;  %v822_v63 = vsel %vm814_vm0, %v2114_v59, 0.0 }
 0x1cd   : > { %v844_v0 = vmul.f32 %v2119_v62, %v2119_v62  ;;  %v975_v1 = vrot.slane %v2119_v62, 2  ;;  %v2126_v2 = vpop.f32.mrb[2].mxu1  ;;  %v823_v3 = vadd.f32 %v822_v63, %v821_v44  ;;  %v824_v4 = vsel %vm814_vm0, %v2119_v62, 0.0 }
 0x1ce   : > { %v2130_v5 = vpop.f32.mrb[3].mxu1  ;;  %v826_v6 = vsel %vm814_vm0, %v2126_v2, 0.0  ;;  %v976_v7 = vrot.slane %v2126_v2, 2  ;;  %v993_v8 = vsel %vm814_vm0, %v974_v61, 0.0  ;;  %v845_v10 = vmul.f32 %v2126_v2, %v2126_v2 }
 0x1cf   : > { %v825_v9 = vadd.f32 %v824_v4, %v823_v3  ;;  %v1023_v11 = vrot.slane %v844_v0, 2  ;;  %v977_v12 = vrot.slane %v2130_v5, 2  ;;  %v994_v14 = vadd.f32 %v993_v8, %v992_v55 }
 0x1d0   : > { %v995_v16 = vsel %vm814_vm0, %v975_v1, 0.0  ;;  %v997_v18 = vsel %vm814_vm0, %v976_v7, 0.0  ;;  %v854_v21 = vsel %vm814_vm0, %v843_v60, 0.0  ;;  %v856_v22 = vsel %vm814_vm0, %v844_v0, 0.0 }
 0x1d1   : > { %v827_v17 = vadd.f32 %v826_v6, %v825_v9  ;;  %v828_v19 = vsel %vm814_vm0, %v2130_v5, 0.0  ;;  %v996_v24 = vadd.f32 %v995_v16, %v994_v14  ;;  %v846_v25 = vmul.f32 %v2130_v5, %v2130_v5 }
 0x1d2   : > { %v855_v26 = vadd.f32 %v854_v21, %v853_v56  ;;  %v858_v29 = vsel %vm814_vm0, %v845_v10, 0.0  ;;  %v1022_v30 = vrot.slane %v843_v60, 2  ;;  %v1024_v31 = vrot.slane %v845_v10, 2 }
 0x1d3   : > { %v829_v27 = vadd.f32 %v828_v19, %v827_v17  ;;  %v998_v33 = vadd.f32 %v997_v18, %v996_v24  ;;  %v999_v35 = vsel %vm814_vm0, %v977_v12, 0.0  ;;  %v1043_v37 = vsel %vm814_vm0, %v1023_v11, 0.0 }
 0x1d4   : > { %v857_v34 = vadd.f32 %v856_v22, %v855_v26  ;;  %v1041_v36 = vsel %vm814_vm0, %v1022_v30, 0.0  ;;  %v860_v41 = vsel %vm814_vm0, %v846_v25, 0.0  ;;  %v1025_v42 = vrot.slane %v846_v25, 2 }
 0x1d5   : > { %830 = vadd.xlane.f32.xlu0 %v829_v27  ;;  %v1000_v38 = vadd.f32 %v999_v35, %v998_v33  ;;  %v1042_v40 = vadd.f32 %v1041_v36, %v1040_v58  ;;  %v1045_v43 = vsel %vm814_vm0, %v1024_v31, 0.0 }
 0x1d6   : > { %v859_v39 = vadd.f32 %v858_v29, %v857_v34  ;;  %v1047_v47 = vsel %vm814_vm0, %v1025_v42, 0.0 }
 0x1d7   : > { %1001 = vadd.xlane.f32.xlu1 %v1000_v38  ;;  %v1044_v45 = vadd.f32 %v1043_v37, %v1042_v40 }
 0x1d8   : > { %v861_v44 = vadd.f32 %v860_v41, %v859_v39 }
 0x1d9   : > { %v1046_v46 = vadd.f32 %v1045_v43, %v1044_v45 }
 0x1da   : > { %862 = vadd.xlane.f32.xlu0 %v861_v44 }
 0x1db   : > { %v1048_v48 = vadd.f32 %v1047_v47, %v1046_v46 }
 0x1dd   : > { %1049 = vadd.xlane.f32.xlu1 %v1048_v48 }
 0x262   : > { %v831_v49 = vpop.xlane.xlu0 %830 }
 0x263   : > { %v832_v50 = vrot.slane %v831_v49, 4 }
 0x264   : > { %v1002_v0 = vpop.xlane.xlu1 %1001 }
 0x265   : > { %v833_v51 = vadd.f32 %v832_v50, %v831_v49  ;;  %v1003_v3 = vrot.slane %v1002_v0, 4 }
 0x267   : > { %v834_v52 = vrot.slane %v833_v51, 2  ;;  %v863_v53 = vpop.xlane.xlu0 %862  ;;  %v1004_v6 = vadd.f32 %v1003_v3, %v1002_v0 }
 0x268   : > { %v864_v54 = vrot.slane %v863_v53, 4 }
 0x269   : > { %v835_v55 = vadd.f32 %v834_v52, %v833_v51  ;;  %v1005_v8 = vrot.slane %v1004_v6, 2 }
 0x26a   : > { %v865_v56 = vadd.f32 %v864_v54, %v863_v53  ;;  %v1050_v1 = vpop.xlane.xlu1 %1049 }
 0x26b   : > { %v836_v57 = vrot.slane %v835_v55, 1  ;;  %v1051_v4 = vrot.slane %v1050_v1, 4  ;;  %v1006_v11 = vadd.f32 %v1005_v8, %v1004_v6 }
 0x26c   : > { %v866_v32 = vrot.slane %v865_v56, 2 }
 0x26d   : > { %v837_v58 = vadd.f32 %v836_v57, %v835_v55  ;;  %v1052_v7 = vadd.f32 %v1051_v4, %v1050_v1  ;;  %v1007_v14 = vrot.slane %v1006_v11, 1 }
 0x26e   : > { %v867_v60 = vadd.f32 %v866_v32, %v865_v56 }
 0x26f   : > { %1557 = vpush %v837_v58  ;;  %v1053_v9 = vrot.slane %v1052_v7, 2  ;;  %v1008_v18 = vadd.f32 %v1007_v14, %v1006_v11 }
 0x270   : > { %v868_v61 = vrot.slane %v867_v60, 1 }
 0x271   : > { %v1054_v12 = vadd.f32 %v1053_v9, %v1052_v7 }
 0x272   : > { %v869_v63 = vadd.f32 %v868_v61, %v867_v60 }
 0x273   : > { %v1055_v16 = vrot.slane %v1054_v12, 1 }
 0x274   : > { %1559 = vpush %v869_v63 }
 0x275   : > { %v1056_v21 = vadd.f32 %v1055_v16, %v1054_v12 }
 0x2a0   : > { %s1558_s21 = spop %1557 }
 0x2a1   : > { %s2154_s7 = smul.f32 0.00048828125, %s1558_s21 }
 0x2a3   : > { %s877_s8 = smul.f32 %s2154_s7, %s2154_s7 }
 0x2a5   : > { %s1560_s11 = spop %1559 }
 0x2a6   : > { %s876_s13 = smul.f32 0.00048828125, %s1560_s11 }
 0x2a8   : > { %s878_s14 = ssub.f32 %s876_s13, %s877_s8 }
 0x2aa   : > { %s879_s29 = smax.f32 %s1833_s25, %s878_s14 }
 0x2ab   : > { %s880_s24 = sadd.f32 1e-05, %s879_s29 }
 0x2ad   : > { %v881_v10 = vstv %s880_s24 }
 0x2ae   : > { %1654 = vrsqrt.f32 %v881_v10 }
 0x2b8   : > { %v1655_v17 = vpop.eup %1654 }
 0x2b9   : > { %1561 = vpush %v1655_v17 }
 0x2ba   : > { %1563 = vpush %v1008_v18 }
 0x2bb   : > { %1565 = vpush %v1056_v21 }
 0x2ea   : > { %s1562_s10 = spop %1561 }
 0x2eb   : > { %s886_s23 = smul.f32 %s1562_s10, %s885_s30  ;;  %s1564_s9 = spop %1563 }
 0x2ec   : > { %s2164_s5 = smul.f32 0.00048828125, %s1564_s9  ;;  %s1566_s21 = spop %1565 }
 0x2ed   : > { %s888_s8 = smul.f32 %s886_s23, %s2154_s7  ;;  %v890_v22 = vstv %s886_s23  ;;  %s1287_s30 = sshll.u32 %s2043_s26, 5 }
 0x2ee   : > { %s1064_s11 = smul.f32 %s2164_s5, %s2164_s5  ;;  %v891_v19 = vmul.f32 %v890_v22, %v2074_v15  ;;  %v892_v24 = vmul.f32 %v890_v22, %v2081_v20  ;;  %v893_v25 = vmul.f32 %v890_v22, %v2088_v23  ;;  %v894_v26 = vmul.f32 %v890_v22, %v2092_v28 }
 0x2ef   : > { %s889_s13 = ssub.f32 %s887_s6, %s888_s8  ;;  %s1063_s14 = smul.f32 0.00048828125, %s1566_s21  ;;  %v895_v27 = vmul.f32 %v890_v22, %v2114_v59  ;;  %v896_v29 = vmul.f32 %v890_v22, %v2119_v62  ;;  %v897_v30 = vmul.f32 %v890_v22, %v2126_v2  ;;  %v898_v31 = vmul.f32 %v890_v22, %v2130_v5 }
 0x2f0   : > { %s1071_s6 = sadd.s32 1, %s2160_s28  ;;  %s1300_s28 = sshll.u32 %s1883_s19, 9 }
 0x2f1   : > { %v899_v33 = vstv %s889_s13  ;;  %s1065_s7 = ssub.f32 %s1063_s14, %s1064_s11  ;;  %s1072_s10 = sld [smem:[#allocation2 + %s1071_s6]] }
 0x2f2   : > { %v900_v34 = vadd.f32 %v899_v33, %v891_v19  ;;  %v901_v35 = vadd.f32 %v899_v33, %v892_v24  ;;  %v902_v36 = vadd.f32 %v899_v33, %v893_v25  ;;  %v903_v37 = vadd.f32 %v899_v33, %v894_v26  ;;  %s1074_s23 = sld [smem:[#allocation7 + %s1071_s6]]  ;;  %s1151_s19 = scalar_lea.sflag [#allocation4], %s2043_s26 }
 0x2f3   : > { %v904_v38 = vadd.f32 %v899_v33, %v895_v27  ;;  %v905_v39 = vadd.f32 %v899_v33, %v896_v29  ;;  %v906_v40 = vadd.f32 %v899_v33, %v897_v30  ;;  %v907_v41 = vadd.f32 %v899_v33, %v898_v31  ;;  %s1066_s29 = smax.f32 %s1833_s25, %s1065_s7  ;;  %s2183_s25 = scalar_lea.vmem [#allocation11], %s1287_s30 }
 0x2f4   : > { %v908_v42 = vmax.f32 %v900_v34, 0.0  ;;  %v909_v43 = vmax.f32 %v901_v35, 0.0  ;;  %v910_v44 = vmax.f32 %v902_v36, 0.0  ;;  %v911_v45 = vmax.f32 %v903_v37, 0.0  ;;  %s1067_s24 = sadd.f32 1e-05, %s1066_s29  ;;  %s2206_s7 = scalar_lea.hbm %s2258_s4, %s1300_s28 }
 0x2f5   : > { %v912_v46 = vmax.f32 %v904_v38, 0.0  ;;  %v913_v47 = vmax.f32 %v905_v39, 0.0  ;;  %v914_v48 = vmax.f32 %v906_v40, 0.0  ;;  %v915_v49 = vmax.f32 %v907_v41, 0.0 }
 0x2f6   : > { %v924_v50 = vcombine.low %v908_v42, %v909_v43  ;;  %v925_v51 = vcombine.low %v910_v44, %v911_v45  ;;  %v1068_v52 = vstv %s1067_s24  ;;  %s1834_s24 = smov [#allocation11]  }
 0x2f7   : > { %v941_v53 = vcombine.low %v912_v46, %v913_v47  ;;  %v942_v54 = vcombine.low %v914_v48, %v915_v49  ;;  %1656 = vrsqrt.f32 %v1068_v52  ;;  %s1749_s30 = sshll.u32 %s1834_s24, 4  ;;  %s1750_s30 = int_to_ptr.vmem [resolvable:$false] %s1749_s30 }
 0x2f8   : > { %v932_v55 = vrot.slane %v924_v50, %v2057_v13  ;;  %v939_v56 = vrot.slane %v925_v51, %v2057_v13  ;;  %s1751_s6 = scalar_lea.vmem %s1750_s30, 1024 }
 0x2f9   : > { %v949_v57 = vrot.slane %v941_v53, %v2057_v13  ;;  %v956_v32 = vrot.slane %v942_v54, %v2057_v13 }
 0x2fa   : > { %v940_v58 = vcombine.low %v932_v55, %v939_v56 }
 0x2fb   : > { %v957_v60 = vcombine.low %v949_v57, %v956_v32 }
 0x2fc   : > { %960 = vst [vmem:[%s2183_s25] sm:$0xff] %v940_v58 }
 0x2fd   : > { %961 = vst [vmem:[%s2183_s25 + $0x8] sm:$0xff] %v957_v60 }
 0x301   : > { %v1657_v61 = vpop.eup %1656 }
 0x302   : > { %1567 = vpush %v1657_v61 }
 0x333   : > { %s1568_s9 = spop %1567 }
 0x334   : > { %s1073_s21 = smul.f32 %s1568_s9, %s1072_s10 }
 0x336   : > { %s1075_s8 = smul.f32 %s1073_s21, %s2164_s5  ;;  %v1077_v63 = vstv %s1073_s21  ;;  %s1165_s5 = sshll.u32 %s2183_s25, 4  ;;  %s2208_s5 = int_to_ptr.vmem [resolvable:$true] %s1165_s5 }
 0x337   : > { %v1078_v0 = vmul.f32 %v1077_v63, %v2074_v15  ;;  %v1079_v1 = vmul.f32 %v1077_v63, %v2081_v20  ;;  %v1080_v3 = vmul.f32 %v1077_v63, %v2088_v23  ;;  %v1081_v4 = vmul.f32 %v1077_v63, %v2092_v28  ;;  %s1745_s29 = scalar_lea.vmem %s2208_s5, 512  ;;  %p1752_p13 = scmp.lt.s32.totalorder %s2208_s5, %s1750_s30 }
 0x338   : > { %s1076_s11 = ssub.f32 %s1074_s23, %s1075_s8  ;;  %v1082_v6 = vmul.f32 %v1077_v63, %v2114_v59  ;;  %v1083_v7 = vmul.f32 %v1077_v63, %v2119_v62  ;;  %v1084_v8 = vmul.f32 %v1077_v63, %v2126_v2  ;;  %v1085_v9 = vmul.f32 %v1077_v63, %v2130_v5  ;;  %p1746_p6 = scmp.ne.s32.totalorder %s2208_s5, %s1745_s29 }
 0x339   : > { %p1753_p7 = scmp.lt.s32.totalorder %s1751_s6, %s1745_s29 }
 0x33a   : > { %v1086_v10 = vstv %s1076_s11  ;;  %p1747_p12 = pnand %p1746_p6, %p2276_p9 }
 0x33b   : > { %v1087_v11 = vadd.f32 %v1086_v10, %v1078_v0  ;;  %v1088_v12 = vadd.f32 %v1086_v10, %v1079_v1  ;;  %v1089_v14 = vadd.f32 %v1086_v10, %v1080_v3  ;;  %v1090_v16 = vadd.f32 %v1086_v10, %v1081_v4  ;;  %p1754_p1 = por %p1753_p7, %p1752_p13 }
 0x33c   : > { %v1091_v15 = vadd.f32 %v1086_v10, %v1082_v6  ;;  %v1092_v20 = vadd.f32 %v1086_v10, %v1083_v7  ;;  %v1093_v23 = vadd.f32 %v1086_v10, %v1084_v8  ;;  %v1094_v17 = vadd.f32 %v1086_v10, %v1085_v9  ;;  %p1748_p3 = pneg %p1747_p12 }
 0x33d   : > { %v1095_v28 = vmax.f32 %v1087_v11, 0.0  ;;  %v1096_v18 = vmax.f32 %v1088_v12, 0.0  ;;  %v1097_v59 = vmax.f32 %v1089_v14, 0.0  ;;  %v1098_v21 = vmax.f32 %v1090_v16, 0.0 }
 0x33e   : > { %v1099_v62 = vmax.f32 %v1091_v15, 0.0  ;;  %v1100_v22 = vmax.f32 %v1092_v20, 0.0  ;;  %v1101_v2 = vmax.f32 %v1093_v23, 0.0  ;;  %v1102_v5 = vmax.f32 %v1094_v17, 0.0  ;;  %p1755_p0 = pnand %p1754_p1, %p1748_p3 }
 0x33f   : > { %v1111_v19 = vcombine.low %v1095_v28, %v1096_v18  ;;  %v1112_v24 = vcombine.low %v1097_v59, %v1098_v21 }
 0x340   : > { %v1128_v25 = vcombine.low %v1099_v62, %v1100_v22  ;;  %v1129_v26 = vcombine.low %v1101_v2, %v1102_v5 }
 0x341   : > { %v1119_v27 = vrot.slane %v1111_v19, %v2057_v13  ;;  %v1126_v29 = vrot.slane %v1112_v24, %v2057_v13 }
 0x342   : > { %v1136_v30 = vrot.slane %v1128_v25, %v2057_v13  ;;  %v1143_v31 = vrot.slane %v1129_v26, %v2057_v13 }
 0x343   : > { %v1127_v33 = vcombine.high %v1119_v27, %v1126_v29 }
 0x344   : > { %v1144_v34 = vcombine.high %v1136_v30, %v1143_v31 }
 0x345   : > { %1289 = vst [vmem:[%s2183_s25 + $0x10] sm:$0xff] %v1127_v33 }
 0x346   : > { %1290 = vst [vmem:[%s2183_s25 + $0x18] sm:$0xff] %v1144_v34 }
 0x347   : > { %1758 = shalt.err (!%p1755_p0)
}
 0x348   : > { %s1759_s25 = scalar_lea.hbm %s2206_s7, 512  ;;  %s1763_s9 = scalar_lea.hbm %s2258_s4, 1024 }
 0x349   : > { %p1760_p5 = scmp.ne.s32.totalorder %s2206_s7, %s1759_s25  ;;  %p1764_p8 = scmp.lt.u32.totalorder %s2206_s7, %s2258_s4 }
 0x34a   : > { %p1765_p11 = scmp.lt.u32.totalorder %s1763_s9, %s1759_s25  ;;  %p1767_p6 = scmp.lt.u32.totalorder %s1759_s25, %s2206_s7 }
 0x34b   : > { %p1761_p4 = pnand %p1760_p5, %p2276_p9 }
 0x34c   : > { %p1766_p2 = por %p1765_p11, %p1764_p8 }
 0x34d   : > { %p1762_p10 = pneg %p1761_p4 }
 0x34e   : > { %p1768_p12 = por %p1767_p6, %p1766_p2 }
 0x350   : > { %p1769_p3 = pnand %p1768_p12, %p1762_p10 }
 0x352   : > { %1772 = shalt.err (!%p1769_p3)
}
 0x353   : > { %s1835_s11 = smov 256   ;;  %s1836_s28 = smov 16  }
 0x354   : > { %1583 = dma.vmem_to_hbm [thread:$0]  (%p2276_p9), %s2208_s5, 512, %s2206_s7, %s1151_s19, %s1835_s11, %s1835_s11, %s1836_s28  }
 0x355 PF: > { %s1180_s13 = sand.u32 1, %s1811_s15   ;;  %p2277_p13 = scmp.ne.s32.totalorder %s2263_s22, 0 }
 0x356   : > { %p2278_p7 = scmp.ge.s32.totalorder %s1823_s18, 2  ;;  %s1181_s14 = scalar_lea.sflag [#allocation4], %s1180_s13 }
 0x358   : > { %p1600_p1 = pnand %p2278_p7, %p2277_p13 }
 0x35a   : > { %1806 = dma.done.wait (!%p1600_p1), %s1181_s14, 512  }
 0x35b   : > { %1808 = vsyncadd (!%p1600_p1), %s1181_s14, 4294966784  ;;  %p20_p0 = scmp.ge.s32.totalorder %s1971_s12, 4   ;;  %s2279_s15 = smov %s1815_s16 }
 0x35c   : > { %s2280_s16 = smov %s1819_s17  ;;  %s2281_s17 = smov %s1981_s20 }
 0x35d   : > { %s2282_s18 = smov %s1971_s12  ;;  %22 = sbr.rel (!%p20_p0) target bundleno = 8 (0x8), region = 96 }
 0x364   :  { %1186 = vsyncpa [#allocation3], 1 }
 0x365   :  { %1188 = vsyncpa [#allocation3 + $0x1], 1 }
 0x366   :  { %1189 = vsyncpa [#allocation10], 1 }
 0x367   :  { %1190 = vsyncpa [#allocation4], 1 }
 0x368   :  { %1192 = vsyncpa [#allocation4 + $0x1], 1 }
 0x369   :  { %1193 = vsyncpa [#allocation5], 1 }
 0x36a   :  { %1195 = vsyncpa [#allocation5 + $0x1], 1 }
 0x36b   :  { %1196 = vsyncpa [#allocation6], 1 }
 0x36c   :  { %1198 = vsyncpa [#allocation6 + $0x1], 1 }

</bundles_post_ra>
